<compile_context>
chip_gen: v7x
topology: tpu7x:2x2x1
jax: 0.10.0
libtpu: 0.0.40
codegen_flags: <defaults>
</compile_context>

<pallas_src>
import functools
import math

import numpy as np
import jax
import jax.numpy as jnp
from jax.experimental import pallas as pl
from jax.experimental.pallas import tpu as pltpu


# ----------------------------------------------------------------------------
# position encoding (computed exactly like the PyTorch position_encoding class)
# ----------------------------------------------------------------------------
def position_encoding_np(obs_length, d_model):
    pos = np.arange(obs_length)[:, np.newaxis]
    i = np.arange(d_model)[np.newaxis, :]
    angle_rates = 1 / np.power(10000, 2 * (i // 2) / np.float32(d_model))
    angle_rads = pos * angle_rates
    angle_rads[:, 0::2] = np.sin(angle_rads[:, 0::2])
    angle_rads[:, 1::2] = np.cos(angle_rads[:, 1::2])
    return angle_rads.astype(np.float32)      # (obs_length, d_model)


# ----------------------------------------------------------------------------
# One-time parameter / constant preparation (review item: precompute kron /
# tile / selector constants outside the per-call path).
# ----------------------------------------------------------------------------
def prepare_temporal_attention(params, num_heads, num_joints, seq_len):
    wq, bq, wk, bk, wv, bv, wo, bo = [np.asarray(p, np.float32) for p in params]
    D = wq.shape[0]
    J, H, S = num_joints, num_heads, seq_len
    JD = J * D
    dp = D // H
    G = J * H
    GS = G * S
    scale = 1.0 / math.sqrt(dp)

    # fold the 1/sqrt(dp) attention scale into the Q projection
    wq_s = wq * scale
    bq_s = bq * scale

    # fused, block-diagonal (per joint) QKV weights / bias
    eye_j = np.eye(J, dtype=np.float32)
    wqkv = np.concatenate([np.kron(eye_j, wq_s),
                           np.kron(eye_j, wk),
                           np.kron(eye_j, wv)], axis=1)          # (JD, 3*JD)
    bqkv = np.concatenate([np.tile(bq_s, (1, J)),
                           np.tile(bk, (1, J)),
                           np.tile(bv, (1, J))], axis=1)         # (1, 3*JD)

    # fold the positional encoding into the bias: (x+pe)W + b = xW + (peW + b)
    pe = position_encoding_np(S, D)                              # (S, D)
    pe_t = np.tile(pe, (1, J))                                   # (S, JD)
    bqkv_full = pe_t @ wqkv + bqkv                               # (S, 3*JD)

    wo_bd = np.kron(eye_j, wo)                                   # (JD, JD)
    bo_t = np.tile(bo, (1, J))                                   # (1, JD)

    # constant group selectors / block-diagonal masks (built once, stored bf16)
    col = np.arange(GS)
    sel_k = (np.arange(S)[:, None] == (col % S)[None, :]).astype(np.float32)   # (S, GS)
    sel_v = np.ascontiguousarray(sel_k.T)                                      # (GS, S)
    bd_k = ((np.arange(JD)[:, None] // dp) ==
            (col[None, :] // S)).astype(np.float32)                            # (JD, GS)
    bd_v = np.ascontiguousarray(bd_k.T)                                        # (GS, JD)
    bd_s = ((col[:, None] // S) == (col[None, :] // S)).astype(np.float32)     # (GS, GS)

    bf16 = jnp.bfloat16
    return dict(
        wqkv=jnp.asarray(wqkv, bf16),
        bqkv=jnp.asarray(bqkv_full, jnp.float32),
        wo=jnp.asarray(wo_bd, bf16),
        bo=jnp.asarray(bo_t, jnp.float32),
        sel_k=jnp.asarray(sel_k, bf16),
        sel_v=jnp.asarray(sel_v, bf16),
        bd_k=jnp.asarray(bd_k, bf16),
        bd_v=jnp.asarray(bd_v, bf16),
        bd_s=jnp.asarray(bd_s, bf16),
        num_joints=J, num_heads=H, seq_len=S, d_model=D)


# ----------------------------------------------------------------------------
# Pallas kernel: fused QKV (bf16 MXU, f32 acc) + all-(joint,head)-group
# attention with per-group softmax + output projection, for one program's
# block of `batch_per_program` batch elements folded into the row dimension.
# ----------------------------------------------------------------------------
def temporal_attention_kernel(x_ref, wqkv_ref, bqkv_ref, wo_ref, bo_ref,
                              mask_ref, sel_k_ref, sel_v_ref,
                              bd_k_ref, bd_v_ref, bd_s_ref,
                              out_ref, o_scratch,
                              *, batch_per_program, seq_len):
    S = seq_len
    JD = x_ref.shape[-1]

    # fused QKV projection over all rows of this program (M = bpp*S)
    xb = x_ref[...].astype(jnp.bfloat16)                          # (R, JD)
    qkv_nb = jnp.dot(xb, wqkv_ref[...],
                     preferred_element_type=jnp.float32)          # (R, 3*JD) f32

    # precomputed constant selectors / block-diagonal masks (bf16, resident)
    sel_k = sel_k_ref[...]                                        # (S, GS)
    sel_v = sel_v_ref[...]                                        # (GS, S)
    bd_k = bd_k_ref[...]                                          # (JD, GS)
    bd_v = bd_v_ref[...]                                          # (GS, JD)
    bd_s = bd_s_ref[...]                                          # (GS, GS)

    # replicate the (S, S) additive look-ahead mask to every (joint, head)
    # group with one tiny selector matmul (keeps everything 2-D, lane-dense)
    mask_big = jnp.dot(mask_ref[...].astype(jnp.bfloat16), sel_k,
                       preferred_element_type=jnp.float32)        # (S, GS) f32

    bqkv = bqkv_ref[...]                                          # (S, 3*JD) f32

    for b in range(batch_per_program):                            # small static unroll
        qkv = qkv_nb[b * S:(b + 1) * S] + bqkv                    # (S, 3*JD) f32
        q = qkv[:, :JD].astype(jnp.bfloat16)                      # scale folded in
        kT = qkv[:, JD:2 * JD].T.astype(jnp.bfloat16)             # (JD, S)
        v = qkv[:, 2 * JD:].astype(jnp.bfloat16)                  # (S, JD)

        # replicate each group's K^T / V into block-diagonal operands
        k_big = (jnp.dot(kT, sel_k, preferred_element_type=jnp.float32)
                 .astype(jnp.bfloat16) * bd_k)                    # (JD, GS)
        v_big = (jnp.dot(sel_v, v, preferred_element_type=jnp.float32)
                 .astype(jnp.bfloat16) * bd_v)                    # (GS, JD)

        # logits for ALL (joint, head) groups in one lane-dense (S, G*S) tile
        logits = jnp.dot(q, k_big,
                         preferred_element_type=jnp.float32) + mask_big

        # batched per-group softmax (f32).  Per-row max (>= per-group max) is
        # a valid stabilizer; the shift cancels in the normalization.
        m = jnp.max(logits, axis=-1, keepdims=True)
        e = jnp.exp(logits - m)
        denom = jnp.dot(e.astype(jnp.bfloat16), bd_s,
                        preferred_element_type=jnp.float32)       # group sums per lane
        denom = jnp.maximum(denom, 1e-20)                         # guard underflowed groups
        p = (e * pl.reciprocal(denom, approx=True)).astype(jnp.bfloat16)

        # attention output, lanes already in "concat heads per joint" order
        o_scratch[b * S:(b + 1) * S, :] = jnp.dot(
            p, v_big, preferred_element_type=jnp.float32)         # (S, JD)

    # concat_linear: one block-diagonal matmul over all rows + one bias add
    out = jnp.dot(o_scratch[...].astype(jnp.bfloat16), wo_ref[...],
                  preferred_element_type=jnp.float32) + bo_ref[...]
    out_ref[...] = out.astype(out_ref.dtype)


# ----------------------------------------------------------------------------
# Wrapper
# ----------------------------------------------------------------------------
def _default_num_programs(batch):
    """One program (full batch fold into M) on single-TC chips; a 2-wide
    parallel grid on dual-TensorCore v7x chips."""
    try:
        kind = jax.devices()[0].device_kind.lower()
    except Exception:
        kind = ""
    if "v7" in kind and batch % 2 == 0:
        return 2
    return 1


def temporal_attention_forward(x, mask, prepared, num_programs=None):
    """x: (B, S, J, D) float32, mask: (S-1, S-1).  Returns ((B, S, J, D), mask)."""
    B, S, J, D = x.shape
    assert S == prepared["seq_len"] and J == prepared["num_joints"]
    assert D == prepared["d_model"]
    JD = J * D
    GS = prepared["bd_s"].shape[0]

    if num_programs is None:
        num_programs = _default_num_programs(B)
    if B % num_programs != 0:
        num_programs = 1
    bpp = B // num_programs            # batches per program
    R = bpp * S                        # rows per program

    # lane-dense layout: (B*S, J*D).  Pure reshape (contiguous), no transpose.
    x_flat = x.reshape(B * S, JD)

    # additive mask: logits[..., 1:, 1:] += mask * -1e9 (single (S, S) tile)
    mask_add = jnp.zeros((S, S), jnp.float32)
    mask_add = mask_add.at[1:, 1:].set(mask.astype(jnp.float32) * -1e9)

    def full(shape):
        return pl.BlockSpec(shape, lambda p: (0,) * len(shape))

    out_flat = pl.pallas_call(
        functools.partial(temporal_attention_kernel,
                          batch_per_program=bpp, seq_len=S),
        out_shape=jax.ShapeDtypeStruct((B * S, JD), jnp.float32),
        grid_spec=pltpu.PrefetchScalarGridSpec(
            num_scalar_prefetch=0,
            grid=(num_programs,),
            in_specs=[
                pl.BlockSpec((R, JD), lambda p: (p, 0)),          # x rows (B folded into M)
                full((JD, 3 * JD)),                               # fused QKV weight (bf16)
                full((S, 3 * JD)),                                # fused bias (+PE, +scale)
                full((JD, JD)),                                   # Wo (block-diag, bf16)
                full((1, JD)),                                    # bo
                full((S, S)),                                     # additive mask tile
                full((S, GS)),                                    # sel_k
                full((GS, S)),                                    # sel_v
                full((JD, GS)),                                   # bd_k
                full((GS, JD)),                                   # bd_v
                full((GS, GS)),                                   # bd_s
            ],
            out_specs=pl.BlockSpec((R, JD), lambda p: (p, 0)),
            scratch_shapes=[pltpu.VMEM((R, JD), jnp.float32)],    # per-program attn output
        ),
        compiler_params=pltpu.CompilerParams(
            dimension_semantics=("parallel",)),
    )(x_flat, prepared["wqkv"], prepared["bqkv"], prepared["wo"], prepared["bo"],
      mask_add, prepared["sel_k"], prepared["sel_v"],
      prepared["bd_k"], prepared["bd_v"], prepared["bd_s"])

    out = out_flat.reshape(B, S, J, D)
    return out, mask


# ----------------------------------------------------------------------------
# Pure-JAX reference (mirrors the PyTorch forward) for a correctness check
# ----------------------------------------------------------------------------
def reference_forward(x, mask, params, num_heads):
    wq, bq, wk, bk, wv, bv, wo, bo = params
    B, S, J, D = x.shape
    dp = D // num_heads
    pe = jnp.asarray(position_encoding_np(S, D))
    xp = x + pe[None, :, None, :]
    xp = jnp.transpose(xp, (0, 2, 1, 3))                          # (B, J, S, D)
    q = xp @ wq + bq[0]
    k = xp @ wk + bk[0]
    v = xp @ wv + bv[0]

    def heads(t):
        return t.reshape(B, J, S, num_heads, dp).transpose(0, 1, 3, 2, 4)

    qh, kh, vh = heads(q), heads(k), heads(v)                     # (B, J, H, S, dp)
    logits = jnp.einsum('bjhsd,bjhtd->bjhst', qh, kh) / math.sqrt(dp)
    mask_add = jnp.zeros((S, S), jnp.float32).at[1:, 1:].set(
        mask.astype(jnp.float32) * -1e9)
    logits = logits + mask_add
    p = jax.nn.softmax(logits, axis=-1)
    o = jnp.einsum('bjhst,bjhtd->bjhsd', p, vh)                   # (B, J, H, S, dp)
    o = o.transpose(0, 3, 1, 2, 4).reshape(B, S, J, D)
    return o @ wo + bo[0]


# ----------------------------------------------------------------------------
# Main
# ----------------------------------------------------------------------------
if __name__ == "__main__":
    # small shapes consistent with the module
    B, S, J, D, H = 2, 8, 4, 32, 4      # batch, seq, joints, d_model, heads (J*D = 128)

    key = jax.random.PRNGKey(0)
    kx, kq, kk, kv, ko, kbq, kbk, kbv, kbo = jax.random.split(key, 9)

    # deterministic parameter init, std = sqrt(1/sqrt(out*in)) like initialize()
    std = np.sqrt(1.0 / math.sqrt(D * D))
    # weights stored pre-transposed to (in, out); biases as (1, out)
    wq = jax.random.normal(kq, (D, D), jnp.float32) * std
    wk = jax.random.normal(kk, (D, D), jnp.float32) * std
    wv = jax.random.normal(kv, (D, D), jnp.float32) * std
    wo = jax.random.normal(ko, (D, D), jnp.float32) * std
    bq = jax.random.normal(kbq, (1, D), jnp.float32) * 0.01
    bk = jax.random.normal(kbk, (1, D), jnp.float32) * 0.01
    bv = jax.random.normal(kbv, (1, D), jnp.float32) * 0.01
    bo = jax.random.normal(kbo, (1, D), jnp.float32) * 0.01
    params = (wq, bq, wk, bk, wv, bv, wo, bo)

    x = jax.random.normal(kx, (B, S, J, D), jnp.float32)
    # look-ahead mask over positions 1..S-1 (upper triangular, 1 = masked)
    mask = jnp.triu(jnp.ones((S - 1, S - 1), jnp.float32), k=1)

    prepared = prepare_temporal_attention(params, num_heads=H, num_joints=J,
                                          seq_len=S)
    out, mask_out = temporal_attention_forward(x, mask, prepared)
    out = jax.block_until_ready(out)

    ref = reference_forward(x, mask, params, H)
    # tolerance reflects bf16 MXU inputs (f32 accumulation) plus the EUP
    # approximate reciprocal in the softmax normalization.
    np.testing.assert_allclose(np.asarray(out), np.asarray(ref),
                               rtol=5e-2, atol=5e-2)

    print("KERNEL_OK")
</pallas_src>

<mosaic_0001>
module attributes {stable_mosaic.version = 11 : i64} {
  func.func @temporal_attention_kernel(%arg0: i32, %arg1: memref<16x128xf32, #tpu.memory_space<vmem>>, %arg2: memref<128x384xbf16, #tpu.memory_space<vmem>>, %arg3: memref<8x384xf32, #tpu.memory_space<vmem>>, %arg4: memref<128x128xbf16, #tpu.memory_space<vmem>>, %arg5: memref<1x128xf32, #tpu.memory_space<vmem>>, %arg6: memref<8x8xf32, #tpu.memory_space<vmem>>, %arg7: memref<8x128xbf16, #tpu.memory_space<vmem>>, %arg8: memref<128x8xbf16, #tpu.memory_space<vmem>>, %arg9: memref<128x128xbf16, #tpu.memory_space<vmem>>, %arg10: memref<128x128xbf16, #tpu.memory_space<vmem>>, %arg11: memref<128x128xbf16, #tpu.memory_space<vmem>>, %arg12: memref<16x128xf32, #tpu.memory_space<vmem>>, %arg13: memref<16x128xf32, #tpu.memory_space<vmem>>) attributes {dimension_semantics = [#tpu.dimension_semantics<parallel>], iteration_bounds = array<i64: 1>, scalar_prefetch = 0 : i64, scratch_operands = 1 : i64, tpu.core_type = #tpu.core_type<tc>, window_params = [{transform_indices = @transform_0, window_bounds = array<i64: 16, 128>}, {pipeline_mode = #tpu.pipeline_mode<synchronous>, transform_indices = @transform_1, window_bounds = array<i64: 128, 384>}, {pipeline_mode = #tpu.pipeline_mode<synchronous>, transform_indices = @transform_2, window_bounds = array<i64: 8, 384>}, {pipeline_mode = #tpu.pipeline_mode<synchronous>, transform_indices = @transform_3, window_bounds = array<i64: 128, 128>}, {pipeline_mode = #tpu.pipeline_mode<synchronous>, transform_indices = @transform_4, window_bounds = array<i64: 1, 128>}, {pipeline_mode = #tpu.pipeline_mode<synchronous>, transform_indices = @transform_5, window_bounds = array<i64: 8, 8>}, {pipeline_mode = #tpu.pipeline_mode<synchronous>, transform_indices = @transform_6, window_bounds = array<i64: 8, 128>}, {pipeline_mode = #tpu.pipeline_mode<synchronous>, transform_indices = @transform_7, window_bounds = array<i64: 128, 8>}, {pipeline_mode = #tpu.pipeline_mode<synchronous>, transform_indices = @transform_8, window_bounds = array<i64: 128, 128>}, {pipeline_mode = #tpu.pipeline_mode<synchronous>, transform_indices = @transform_9, window_bounds = array<i64: 128, 128>}, {pipeline_mode = #tpu.pipeline_mode<synchronous>, transform_indices = @transform_10, window_bounds = array<i64: 128, 128>}, {transform_indices = @transform_11, window_bounds = array<i64: 16, 128>}]} {
    %c0 = arith.constant 0 : index
    %c0_0 = arith.constant 0 : index
    %0 = vector.load %arg1[%c0, %c0_0] : memref<16x128xf32, #tpu.memory_space<vmem>>, vector<16x128xf32>
    %1 = arith.truncf %0 : vector<16x128xf32> to vector<16x128xbf16>
    %c0_1 = arith.constant 0 : index
    %c0_2 = arith.constant 0 : index
    %2 = vector.load %arg2[%c0_1, %c0_2] : memref<128x384xbf16, #tpu.memory_space<vmem>>, vector<128x384xbf16>
    %cst = arith.constant dense<0.000000e+00> : vector<16x384xf32>
    %3 = tpu.matmul %1, %2, %cst {dimension_numbers = #tpu.dot_dimension_numbers<[1], [0], [0], [1], [0, 0, 1, 1], [], []>} : vector<16x128xbf16>, vector<128x384xbf16>, vector<16x384xf32> -> vector<16x384xf32>
    %c0_3 = arith.constant 0 : index
    %c0_4 = arith.constant 0 : index
    %4 = vector.load %arg7[%c0_3, %c0_4] : memref<8x128xbf16, #tpu.memory_space<vmem>>, vector<8x128xbf16>
    %c0_5 = arith.constant 0 : index
    %c0_6 = arith.constant 0 : index
    %5 = vector.load %arg8[%c0_5, %c0_6] : memref<128x8xbf16, #tpu.memory_space<vmem>>, vector<128x8xbf16>
    %c0_7 = arith.constant 0 : index
    %c0_8 = arith.constant 0 : index
    %6 = vector.load %arg9[%c0_7, %c0_8] : memref<128x128xbf16, #tpu.memory_space<vmem>>, vector<128x128xbf16>
    %c0_9 = arith.constant 0 : index
    %c0_10 = arith.constant 0 : index
    %7 = vector.load %arg10[%c0_9, %c0_10] : memref<128x128xbf16, #tpu.memory_space<vmem>>, vector<128x128xbf16>
    %c0_11 = arith.constant 0 : index
    %c0_12 = arith.constant 0 : index
    %8 = vector.load %arg11[%c0_11, %c0_12] : memref<128x128xbf16, #tpu.memory_space<vmem>>, vector<128x128xbf16>
    %c0_13 = arith.constant 0 : index
    %c0_14 = arith.constant 0 : index
    %9 = vector.load %arg6[%c0_13, %c0_14] : memref<8x8xf32, #tpu.memory_space<vmem>>, vector<8x8xf32>
    %10 = arith.truncf %9 : vector<8x8xf32> to vector<8x8xbf16>
    %cst_15 = arith.constant dense<0.000000e+00> : vector<8x128xf32>
    %11 = tpu.matmul %10, %4, %cst_15 {dimension_numbers = #tpu.dot_dimension_numbers<[1], [0], [0], [1], [0, 0, 1, 1], [], []>} : vector<8x8xbf16>, vector<8x128xbf16>, vector<8x128xf32> -> vector<8x128xf32>
    %c0_16 = arith.constant 0 : index
    %c0_17 = arith.constant 0 : index
    %12 = vector.load %arg3[%c0_16, %c0_17] : memref<8x384xf32, #tpu.memory_space<vmem>>, vector<8x384xf32>
    %13 = vector.extract_strided_slice %3 {offsets = [0, 0], sizes = [8, 384], strides = [1, 1]} : vector<16x384xf32> to vector<8x384xf32>
    %14 = arith.addf %13, %12 : vector<8x384xf32>
    %15 = vector.extract_strided_slice %14 {offsets = [0, 0], sizes = [8, 128], strides = [1, 1]} : vector<8x384xf32> to vector<8x128xf32>
    %16 = arith.truncf %15 : vector<8x128xf32> to vector<8x128xbf16>
    %17 = vector.extract_strided_slice %14 {offsets = [0, 128], sizes = [8, 128], strides = [1, 1]} : vector<8x384xf32> to vector<8x128xf32>
    %18 = tpu.transpose %17, [1, 0] : vector<8x128xf32> -> vector<128x8xf32>
    %19 = arith.truncf %18 : vector<128x8xf32> to vector<128x8xbf16>
    %20 = vector.extract_strided_slice %14 {offsets = [0, 256], sizes = [8, 128], strides = [1, 1]} : vector<8x384xf32> to vector<8x128xf32>
    %21 = arith.truncf %20 : vector<8x128xf32> to vector<8x128xbf16>
    %cst_18 = arith.constant dense<0.000000e+00> : vector<128x128xf32>
    %22 = tpu.matmul %19, %4, %cst_18 {dimension_numbers = #tpu.dot_dimension_numbers<[1], [0], [0], [1], [0, 0, 1, 1], [], []>} : vector<128x8xbf16>, vector<8x128xbf16>, vector<128x128xf32> -> vector<128x128xf32>
    %23 = arith.truncf %22 : vector<128x128xf32> to vector<128x128xbf16>
    %24 = arith.mulf %23, %6 : vector<128x128xbf16>
    %cst_19 = arith.constant dense<0.000000e+00> : vector<128x128xf32>
    %25 = tpu.matmul %5, %21, %cst_19 {dimension_numbers = #tpu.dot_dimension_numbers<[1], [0], [0], [1], [0, 0, 1, 1], [], []>} : vector<128x8xbf16>, vector<8x128xbf16>, vector<128x128xf32> -> vector<128x128xf32>
    %26 = arith.truncf %25 : vector<128x128xf32> to vector<128x128xbf16>
    %27 = arith.mulf %26, %7 : vector<128x128xbf16>
    %cst_20 = arith.constant dense<0.000000e+00> : vector<8x128xf32>
    %28 = tpu.matmul %16, %24, %cst_20 {dimension_numbers = #tpu.dot_dimension_numbers<[1], [0], [0], [1], [0, 0, 1, 1], [], []>} : vector<8x128xbf16>, vector<128x128xbf16>, vector<8x128xf32> -> vector<8x128xf32>
    %29 = arith.addf %28, %11 : vector<8x128xf32>
    %cst_21 = arith.constant dense<0xFF800000> : vector<8xf32>
    %30 = vector.multi_reduction <maximumf>, %29, %cst_21 [1] : vector<8x128xf32> to vector<8xf32>
    %31 = vector.shape_cast %30 : vector<8xf32> to vector<8x1xf32>
    %32 = vector.broadcast %31 : vector<8x1xf32> to vector<8x128xf32>
    %33 = arith.subf %29, %32 : vector<8x128xf32>
    %34 = math.exp %33 : vector<8x128xf32>
    %35 = arith.truncf %34 : vector<8x128xf32> to vector<8x128xbf16>
    %cst_22 = arith.constant dense<0.000000e+00> : vector<8x128xf32>
    %36 = tpu.matmul %35, %8, %cst_22 {dimension_numbers = #tpu.dot_dimension_numbers<[1], [0], [0], [1], [0, 0, 1, 1], [], []>} : vector<8x128xbf16>, vector<128x128xbf16>, vector<8x128xf32> -> vector<8x128xf32>
    %cst_23 = arith.constant 9.99999968E-21 : f32
    %37 = vector.broadcast %cst_23 : f32 to vector<8x128xf32>
    %38 = arith.maximumf %36, %37 : vector<8x128xf32>
    %39 = tpu.reciprocal %38 {approx = true} : vector<8x128xf32> -> vector<8x128xf32>
    %40 = arith.mulf %34, %39 : vector<8x128xf32>
    %41 = arith.truncf %40 : vector<8x128xf32> to vector<8x128xbf16>
    %cst_24 = arith.constant dense<0.000000e+00> : vector<8x128xf32>
    %42 = tpu.matmul %41, %27, %cst_24 {dimension_numbers = #tpu.dot_dimension_numbers<[1], [0], [0], [1], [0, 0, 1, 1], [], []>} : vector<8x128xbf16>, vector<128x128xbf16>, vector<8x128xf32> -> vector<8x128xf32>
    %c0_25 = arith.constant 0 : index
    %c0_26 = arith.constant 0 : index
    %43 = vector.load %arg13[%c0_25, %c0_26] : memref<16x128xf32, #tpu.memory_space<vmem>>, vector<8x128xf32>
    tpu.vector_store %arg13[%c0_25, %c0_26], %42 {strides = array<i32>} : memref<16x128xf32, #tpu.memory_space<vmem>>, vector<8x128xf32>,
    %44 = vector.extract_strided_slice %3 {offsets = [8, 0], sizes = [8, 384], strides = [1, 1]} : vector<16x384xf32> to vector<8x384xf32>
    %45 = arith.addf %44, %12 : vector<8x384xf32>
    %46 = vector.extract_strided_slice %45 {offsets = [0, 0], sizes = [8, 128], strides = [1, 1]} : vector<8x384xf32> to vector<8x128xf32>
    %47 = arith.truncf %46 : vector<8x128xf32> to vector<8x128xbf16>
    %48 = vector.extract_strided_slice %45 {offsets = [0, 128], sizes = [8, 128], strides = [1, 1]} : vector<8x384xf32> to vector<8x128xf32>
    %49 = tpu.transpose %48, [1, 0] : vector<8x128xf32> -> vector<128x8xf32>
    %50 = arith.truncf %49 : vector<128x8xf32> to vector<128x8xbf16>
    %51 = vector.extract_strided_slice %45 {offsets = [0, 256], sizes = [8, 128], strides = [1, 1]} : vector<8x384xf32> to vector<8x128xf32>
    %52 = arith.truncf %51 : vector<8x128xf32> to vector<8x128xbf16>
    %cst_27 = arith.constant dense<0.000000e+00> : vector<128x128xf32>
    %53 = tpu.matmul %50, %4, %cst_27 {dimension_numbers = #tpu.dot_dimension_numbers<[1], [0], [0], [1], [0, 0, 1, 1], [], []>} : vector<128x8xbf16>, vector<8x128xbf16>, vector<128x128xf32> -> vector<128x128xf32>
    %54 = arith.truncf %53 : vector<128x128xf32> to vector<128x128xbf16>
    %55 = arith.mulf %54, %6 : vector<128x128xbf16>
    %cst_28 = arith.constant dense<0.000000e+00> : vector<128x128xf32>
    %56 = tpu.matmul %5, %52, %cst_28 {dimension_numbers = #tpu.dot_dimension_numbers<[1], [0], [0], [1], [0, 0, 1, 1], [], []>} : vector<128x8xbf16>, vector<8x128xbf16>, vector<128x128xf32> -> vector<128x128xf32>
    %57 = arith.truncf %56 : vector<128x128xf32> to vector<128x128xbf16>
    %58 = arith.mulf %57, %7 : vector<128x128xbf16>
    %cst_29 = arith.constant dense<0.000000e+00> : vector<8x128xf32>
    %59 = tpu.matmul %47, %55, %cst_29 {dimension_numbers = #tpu.dot_dimension_numbers<[1], [0], [0], [1], [0, 0, 1, 1], [], []>} : vector<8x128xbf16>, vector<128x128xbf16>, vector<8x128xf32> -> vector<8x128xf32>
    %60 = arith.addf %59, %11 : vector<8x128xf32>
    %cst_30 = arith.constant dense<0xFF800000> : vector<8xf32>
    %61 = vector.multi_reduction <maximumf>, %60, %cst_30 [1] : vector<8x128xf32> to vector<8xf32>
    %62 = vector.shape_cast %61 : vector<8xf32> to vector<8x1xf32>
    %63 = vector.broadcast %62 : vector<8x1xf32> to vector<8x128xf32>
    %64 = arith.subf %60, %63 : vector<8x128xf32>
    %65 = math.exp %64 : vector<8x128xf32>
    %66 = arith.truncf %65 : vector<8x128xf32> to vector<8x128xbf16>
    %cst_31 = arith.constant dense<0.000000e+00> : vector<8x128xf32>
    %67 = tpu.matmul %66, %8, %cst_31 {dimension_numbers = #tpu.dot_dimension_numbers<[1], [0], [0], [1], [0, 0, 1, 1], [], []>} : vector<8x128xbf16>, vector<128x128xbf16>, vector<8x128xf32> -> vector<8x128xf32>
    %cst_32 = arith.constant 9.99999968E-21 : f32
    %68 = vector.broadcast %cst_32 : f32 to vector<8x128xf32>
    %69 = arith.maximumf %67, %68 : vector<8x128xf32>
    %70 = tpu.reciprocal %69 {approx = true} : vector<8x128xf32> -> vector<8x128xf32>
    %71 = arith.mulf %65, %70 : vector<8x128xf32>
    %72 = arith.truncf %71 : vector<8x128xf32> to vector<8x128xbf16>
    %cst_33 = arith.constant dense<0.000000e+00> : vector<8x128xf32>
    %73 = tpu.matmul %72, %58, %cst_33 {dimension_numbers = #tpu.dot_dimension_numbers<[1], [0], [0], [1], [0, 0, 1, 1], [], []>} : vector<8x128xbf16>, vector<128x128xbf16>, vector<8x128xf32> -> vector<8x128xf32>
    %c8 = arith.constant 8 : index
    %c0_34 = arith.constant 0 : index
    %74 = vector.load %arg13[%c8, %c0_34] : memref<16x128xf32, #tpu.memory_space<vmem>>, vector<8x128xf32>
    tpu.vector_store %arg13[%c8, %c0_34], %73 {strides = array<i32>} : memref<16x128xf32, #tpu.memory_space<vmem>>, vector<8x128xf32>,
    %c0_35 = arith.constant 0 : index
    %c0_36 = arith.constant 0 : index
    %75 = vector.load %arg13[%c0_35, %c0_36] : memref<16x128xf32, #tpu.memory_space<vmem>>, vector<16x128xf32>
    %76 = arith.truncf %75 : vector<16x128xf32> to vector<16x128xbf16>
    %c0_37 = arith.constant 0 : index
    %c0_38 = arith.constant 0 : index
    %77 = vector.load %arg4[%c0_37, %c0_38] : memref<128x128xbf16, #tpu.memory_space<vmem>>, vector<128x128xbf16>
    %cst_39 = arith.constant dense<0.000000e+00> : vector<16x128xf32>
    %78 = tpu.matmul %76, %77, %cst_39 {dimension_numbers = #tpu.dot_dimension_numbers<[1], [0], [0], [1], [0, 0, 1, 1], [], []>} : vector<16x128xbf16>, vector<128x128xbf16>, vector<16x128xf32> -> vector<16x128xf32>
    %c0_40 = arith.constant 0 : index
    %c0_41 = arith.constant 0 : index
    %79 = vector.load %arg5[%c0_40, %c0_41] : memref<1x128xf32, #tpu.memory_space<vmem>>, vector<1x128xf32>
    %80 = vector.broadcast %79 : vector<1x128xf32> to vector<16x128xf32>
    %81 = arith.addf %78, %80 : vector<16x128xf32>
    %c0_42 = arith.constant 0 : index
    %c0_43 = arith.constant 0 : index
    %82 = vector.load %arg12[%c0_42, %c0_43] : memref<16x128xf32, #tpu.memory_space<vmem>>, vector<16x128xf32>
    tpu.vector_store %arg12[%c0_42, %c0_43], %81 {strides = array<i32>} : memref<16x128xf32, #tpu.memory_space<vmem>>, vector<16x128xf32>,
    return
  }
  func.func @transform_0(%arg0: i32) -> (i32, i32) {
    %c0_i32 = arith.constant 0 : i32
    %c0_i32_0 = arith.constant 0 : i32
    return %arg0, %c0_i32 : i32, i32
  }
  func.func @transform_1(%arg0: i32) -> (i32, i32) {
    %c0_i32 = arith.constant 0 : i32
    %c0_i32_0 = arith.constant 0 : i32
    %c0_i32_1 = arith.constant 0 : i32
    return %c0_i32, %c0_i32_0 : i32, i32
  }
  func.func @transform_2(%arg0: i32) -> (i32, i32) {
    %c0_i32 = arith.constant 0 : i32
    %c0_i32_0 = arith.constant 0 : i32
    %c0_i32_1 = arith.constant 0 : i32
    return %c0_i32, %c0_i32_0 : i32, i32
  }
  func.func @transform_3(%arg0: i32) -> (i32, i32) {
    %c0_i32 = arith.constant 0 : i32
    %c0_i32_0 = arith.constant 0 : i32
    %c0_i32_1 = arith.constant 0 : i32
    return %c0_i32, %c0_i32_0 : i32, i32
  }
  func.func @transform_4(%arg0: i32) -> (i32, i32) {
    %c0_i32 = arith.constant 0 : i32
    %c0_i32_0 = arith.constant 0 : i32
    %c0_i32_1 = arith.constant 0 : i32
    return %c0_i32, %c0_i32_0 : i32, i32
  }
  func.func @transform_5(%arg0: i32) -> (i32, i32) {
    %c0_i32 = arith.constant 0 : i32
    %c0_i32_0 = arith.constant 0 : i32
    %c0_i32_1 = arith.constant 0 : i32
    return %c0_i32, %c0_i32_0 : i32, i32
  }
  func.func @transform_6(%arg0: i32) -> (i32, i32) {
    %c0_i32 = arith.constant 0 : i32
    %c0_i32_0 = arith.constant 0 : i32
    %c0_i32_1 = arith.constant 0 : i32
    return %c0_i32, %c0_i32_0 : i32, i32
  }
  func.func @transform_7(%arg0: i32) -> (i32, i32) {
    %c0_i32 = arith.constant 0 : i32
    %c0_i32_0 = arith.constant 0 : i32
    %c0_i32_1 = arith.constant 0 : i32
    return %c0_i32, %c0_i32_0 : i32, i32
  }
  func.func @transform_8(%arg0: i32) -> (i32, i32) {
    %c0_i32 = arith.constant 0 : i32
    %c0_i32_0 = arith.constant 0 : i32
    %c0_i32_1 = arith.constant 0 : i32
    return %c0_i32, %c0_i32_0 : i32, i32
  }
  func.func @transform_9(%arg0: i32) -> (i32, i32) {
    %c0_i32 = arith.constant 0 : i32
    %c0_i32_0 = arith.constant 0 : i32
    %c0_i32_1 = arith.constant 0 : i32
    return %c0_i32, %c0_i32_0 : i32, i32
  }
  func.func @transform_10(%arg0: i32) -> (i32, i32) {
    %c0_i32 = arith.constant 0 : i32
    %c0_i32_0 = arith.constant 0 : i32
    %c0_i32_1 = arith.constant 0 : i32
    return %c0_i32, %c0_i32_0 : i32, i32
  }
  func.func @transform_11(%arg0: i32) -> (i32, i32) {
    %c0_i32 = arith.constant 0 : i32
    %c0_i32_0 = arith.constant 0 : i32
    return %arg0, %c0_i32 : i32, i32
  }
}

</mosaic_0001>

<bundles_post_ra>
// kernel: tpu_custom_call.1
= control target key start
LH: loop header
LB: loop body
LE: loop exit
PB: predicated region body
PF: predicated region fallthrough
CT: control target
= control target key end

     0   :  { %16 = vsyncpa [#allocation4], 0  ;;  %s2989_s0 = inlined_call_operand.hbm [shape: f32[16,128], index: 0, kind: input, shape index: {}]   ;;  %s2990_s1 = inlined_call_operand.hbm [shape: bf16[128,384], index: 1, kind: input, shape index: {}]   ;;  %s2991_s2 = inlined_call_operand.hbm [shape: f32[8,384], index: 2, kind: input, shape index: {}]   ;;  %s2992_s3 = inlined_call_operand.vmem [shape: bf16[128,128], index: 3, kind: input, shape index: {}]   ;;  %s2993_s4 = inlined_call_operand.vmem [shape: f32[1,128], index: 4, kind: input, shape index: {}]   ;;  %s2994_s5 = inlined_call_operand.vmem [shape: f32[8,8], index: 5, kind: input, shape index: {}]   ;;  %s2995_s6 = inlined_call_operand.vmem [shape: bf16[8,128], index: 6, kind: input, shape index: {}]   ;;  %s2996_s7 = inlined_call_operand.vmem [shape: bf16[128,8], index: 7, kind: input, shape index: {}]   ;;  %s2997_s8 = inlined_call_operand.hbm [shape: bf16[128,128], index: 8, kind: input, shape index: {}]   ;;  %s2998_s9 = inlined_call_operand.hbm [shape: bf16[128,128], index: 9, kind: input, shape index: {}]   ;;  %s2999_s10 = inlined_call_operand.hbm [shape: bf16[128,128], index: 10, kind: input, shape index: {}]   ;;  %s3000_s11 = inlined_call_operand.hbm [shape: f32[16,128], index: 11, kind: output, shape index: {}]  }
   0x1   :  { %17 = vsyncpa [#allocation7], 0 }
   0x2   :  { %18 = vsyncpa [#allocation10], 0 }
   0x3   :  { %19 = vsyncpa [#allocation13], 0 }
   0x4   :  { %20 = vsyncpa [#allocation5], 0  ;;  %s2398_s17 = smov [#allocation6]   ;;  %s2234_s21 = scalar_lea.hbm %s2990_s1, 3072 }
   0x5   :  { %s38_s18 = sshll.u32 %s2398_s17, 4  ;;  %p2235_p0 = scmp.ne.s32.totalorder %s2990_s1, %s2234_s21  ;;  %s39_s18 = int_to_ptr.vmem [resolvable:$true] %s38_s18 }
   0x6   :  { %p2238_p1 = scmp.lt.u32.totalorder %s2234_s21, %s2990_s1 }
   0x8   :  { %p2240_p2 = pnand %p2238_p1, %p2235_p0 }
   0xa   :  { %2243 = shalt.err (!%p2240_p2)
}
   0xb   :  { %s2244_s26 = scalar_lea.vmem %s39_s18, 3072  ;;  %p2249_p4 = scmp.lt.s32.totalorder %s39_s18, %s39_s18 }
   0xc   :  { %p2245_p3 = scmp.ne.s32.totalorder %s39_s18, %s2244_s26  ;;  %p2250_p5 = scmp.lt.s32.totalorder %s2244_s26, %s2244_s26 }
   0xe   :  { %p2251_p6 = por %p2250_p5, %p2249_p4 }
  0x10   :  { %p2252_p7 = pnand %p2251_p6, %p2245_p3 }
  0x12   :  { %2255 = shalt.err (!%p2252_p7)
}
  0x13   :  { %s2399_s27 = smov 192   ;;  %s2400_s28 = smov 12  }
  0x14   :  { %44 = dma.hbm_to_vmem [thread:$0]  %s2990_s1, 3072, %s39_s18, [#allocation7], %s2399_s27, %s2399_s27, %s2400_s28  }
  0x15   :  { %s2401_s12 = smov [#allocation9]   ;;  %s2256_s16 = scalar_lea.hbm %s2997_s8, 1024 }
  0x16   :  { %s70_s13 = sshll.u32 %s2401_s12, 4  ;;  %p2257_p8 = scmp.ne.s32.totalorder %s2997_s8, %s2256_s16  ;;  %s71_s13 = int_to_ptr.vmem [resolvable:$true] %s70_s13 }
  0x17   :  { %p2260_p9 = scmp.lt.u32.totalorder %s2256_s16, %s2997_s8 }
  0x19   :  { %p2262_p10 = pnand %p2260_p9, %p2257_p8 }
  0x1b   :  { %2265 = shalt.err (!%p2262_p10)
}
  0x1c   :  { %s2266_s22 = scalar_lea.vmem %s71_s13, 1024  ;;  %p2271_p12 = scmp.lt.s32.totalorder %s71_s13, %s71_s13 }
  0x1d   :  { %p2267_p11 = scmp.ne.s32.totalorder %s71_s13, %s2266_s22  ;;  %p2272_p13 = scmp.lt.s32.totalorder %s2266_s22, %s2266_s22 }
  0x1f   :  { %p2273_p0 = por %p2272_p13, %p2271_p12 }
  0x21   :  { %p2274_p1 = pnand %p2273_p0, %p2267_p11 }
  0x23   :  { %2277 = shalt.err (!%p2274_p1)
}
  0x24   :  { %s2402_s1 = smov 64   ;;  %s2403_s18 = smov 4  }
  0x25   :  { %76 = dma.hbm_to_vmem [thread:$0]  %s2997_s8, 1024, %s71_s13, [#allocation10], %s2402_s1, %s2402_s1, %s2403_s18  }
  0x26   :  { %s2404_s25 = smov [#allocation3]   ;;  %s2278_s29 = scalar_lea.hbm %s2989_s0, 256 }
  0x27   :  { %s26_s26 = sshll.u32 %s2404_s25, 4  ;;  %p2279_p2 = scmp.ne.s32.totalorder %s2989_s0, %s2278_s29  ;;  %s27_s26 = int_to_ptr.vmem [resolvable:$true] %s26_s26 }
  0x28   :  { %p2282_p3 = scmp.lt.u32.totalorder %s2278_s29, %s2989_s0 }
  0x2a   :  { %p2284_p4 = pnand %p2282_p3, %p2279_p2 }
  0x2c   :  { %2287 = shalt.err (!%p2284_p4)
}
  0x2d   :  { %s2288_s16 = scalar_lea.vmem %s27_s26, 256  ;;  %p2293_p6 = scmp.lt.s32.totalorder %s27_s26, %s27_s26 }
  0x2e   :  { %p2289_p5 = scmp.ne.s32.totalorder %s27_s26, %s2288_s16  ;;  %p2294_p7 = scmp.lt.s32.totalorder %s2288_s16, %s2288_s16 }
  0x30   :  { %p2295_p8 = por %p2294_p7, %p2293_p6 }
  0x32   :  { %p2296_p9 = pnand %p2295_p8, %p2289_p5 }
  0x34   :  { %2299 = shalt.err (!%p2296_p9)
}
  0x35   :  { %s2405_s8 = smov 128   ;;  %s2406_s13 = smov 8  }
  0x36   :  { %32 = dma.hbm_to_vmem [thread:$0]  %s2989_s0, 256, %s27_s26, [#allocation4], %s2405_s8, %s2405_s8, %s2406_s13  }
  0x37   :  { %s2407_s20 = smov [#allocation8]   ;;  %s2408_s22 = smov [#allocation11]  }
  0x38   :  { %s51_s21 = sshll.u32 %s2407_s20, 4  ;;  %s82_s23 = sshll.u32 %s2408_s22, 4  ;;  %s52_s21 = int_to_ptr.vmem [resolvable:$true] %s51_s21  ;;  %s83_s23 = int_to_ptr.vmem [resolvable:$true] %s82_s23 }
  0x39   :  { %s2300_s27 = scalar_lea.hbm %s2991_s2, 384 }
  0x3a   :  { %p2301_p10 = scmp.ne.s32.totalorder %s2991_s2, %s2300_s27  ;;  %p2304_p11 = scmp.lt.u32.totalorder %s2300_s27, %s2991_s2 }
  0x3c   :  { %p2306_p12 = pnand %p2304_p11, %p2301_p10 }
  0x3e   :  { %2309 = shalt.err (!%p2306_p12)
}
  0x3f   :  { %s2310_s0 = scalar_lea.vmem %s52_s21, 384  ;;  %p2315_p0 = scmp.lt.s32.totalorder %s52_s21, %s52_s21 }
  0x40   :  { %p2311_p13 = scmp.ne.s32.totalorder %s52_s21, %s2310_s0  ;;  %p2316_p1 = scmp.lt.s32.totalorder %s2310_s0, %s2310_s0 }
  0x42   :  { %p2317_p2 = por %p2316_p1, %p2315_p0 }
  0x44   :  { %p2318_p3 = pnand %p2317_p2, %p2311_p13 }
  0x46   :  { %2321 = shalt.err (!%p2318_p3)
}
  0x47   :  { %54 = dma.hbm_to_vmem [thread:$0]  %s2991_s2, 384, %s52_s21, [#allocation7]  }
  0x48   :  { %s2322_s17 = scalar_lea.hbm %s2998_s9, 1024 }
  0x49   :  { %p2323_p4 = scmp.ne.s32.totalorder %s2998_s9, %s2322_s17  ;;  %p2326_p5 = scmp.lt.u32.totalorder %s2322_s17, %s2998_s9 }
  0x4b   :  { %p2328_p6 = pnand %p2326_p5, %p2323_p4 }
  0x4d   :  { %2331 = shalt.err (!%p2328_p6)
}
  0x4e   :  { %s2332_s25 = scalar_lea.vmem %s83_s23, 1024  ;;  %p2337_p8 = scmp.lt.s32.totalorder %s83_s23, %s83_s23 }
  0x4f   :  { %p2333_p7 = scmp.ne.s32.totalorder %s83_s23, %s2332_s25  ;;  %p2338_p9 = scmp.lt.s32.totalorder %s2332_s25, %s2332_s25 }
  0x51   :  { %p2339_p10 = por %p2338_p9, %p2337_p8 }
  0x53   :  { %p2340_p11 = pnand %p2339_p10, %p2333_p7 }
  0x55   :  { %2343 = shalt.err (!%p2340_p11)
}
  0x56   :  { %88 = dma.hbm_to_vmem [thread:$0]  %s2998_s9, 1024, %s83_s23, [#allocation10], %s2402_s1, %s2402_s1, %s2403_s18  }
  0x57   :  { %s2409_s27 = smov [#allocation12]   ;;  %s2344_s12 = scalar_lea.hbm %s2999_s10, 1024 }
  0x58   :  { %s94_s28 = sshll.u32 %s2409_s27, 4  ;;  %p2345_p12 = scmp.ne.s32.totalorder %s2999_s10, %s2344_s12  ;;  %s95_s28 = int_to_ptr.vmem [resolvable:$true] %s94_s28 }
  0x59   :  { %p2348_p13 = scmp.lt.u32.totalorder %s2344_s12, %s2999_s10 }
  0x5b   :  { %p2350_p0 = pnand %p2348_p13, %p2345_p12 }
  0x5d   :  { %2353 = shalt.err (!%p2350_p0)
}
  0x5e   :  { %s2354_s16 = scalar_lea.vmem %s95_s28, 1024  ;;  %p2359_p2 = scmp.lt.s32.totalorder %s95_s28, %s95_s28 }
  0x5f   :  { %p2355_p1 = scmp.ne.s32.totalorder %s95_s28, %s2354_s16  ;;  %p2360_p3 = scmp.lt.s32.totalorder %s2354_s16, %s2354_s16 }
  0x61   :  { %p2361_p4 = por %p2360_p3, %p2359_p2 }
  0x63   :  { %p2362_p5 = pnand %p2361_p4, %p2355_p1 }
  0x65   :  { %2365 = shalt.err (!%p2362_p5)
}
  0x66   :  { %100 = dma.hbm_to_vmem [thread:$0]  %s2999_s10, 1024, %s95_s28, [#allocation13], %s2402_s1, %s2402_s1, %s2403_s18  }
  0x67   :  { %2388 = dma.done.wait [#allocation4], 256  }
  0x68   :  { %2389 = vsyncadd [#allocation4], 4294967040 }
  0x69   :  { %2390 = dma.done.wait [#allocation7], 3456  }
  0x6a   :  { %2391 = vsyncadd [#allocation7], 4294963840 }
  0x6b   :  { %2392 = dma.done.wait [#allocation10], 2048  }
  0x6c   :  { %2393 = vsyncadd [#allocation10], 4294965248 }
  0x6d   :  { %2394 = dma.done.wait [#allocation13], 1024  }
  0x6e   :  { %2395 = vsyncadd [#allocation13], 4294966272  ;;  %v2410_v0 = vmov 0   ;;  %v2411_v1 = vmov 0.0   ;;  %vm2412_vm0 = vmmov 0   ;;  %v120_v23 = vld [vmem:[#allocation3] sm:$0xff] }
  0x6f   :  { %315 = vmatprep.mubr.bf16.mxu0 %v2410_v0  ;;  %1896 = vmatprep.subr.bf16.mxu1 %v2411_v1  ;;  %v2154_v2 = vld [vmem:[#allocation6 + $0x4] ss:$12 sps:$4 sm:$0xff]   ;;  %v2156_v3 = vld [vmem:[#allocation6] ss:$12 sps:$4 sm:$0xff]   ;;  %v2157_v4 = vld [vmem:[#allocation6 + $0x1c] ss:$12 sps:$4 sm:$0xff]  }
  0x70   :  { %1912 = vmatprep.mubr.msk.bf16.mxu1 %vm2412_vm0, %v2411_v1  ;;  %283 = vmatprep.subr.bf16.mxu0 %v2154_v2  ;;  %v2159_v5 = vld [vmem:[#allocation6 + $0x18] ss:$12 sps:$4 sm:$0xff]   ;;  %v2160_v6 = vld [vmem:[#allocation6 + $0x34] ss:$12 sps:$4 sm:$0xff]   ;;  %v2162_v7 = vld [vmem:[#allocation6 + $0x30] ss:$12 sps:$4 sm:$0xff]  }
  0x71   :  { %284 = vmatpush1.bf16.msra.mxu0 %v2156_v3  ;;  %v2163_v8 = vld [vmem:[#allocation6 + $0x4c] ss:$12 sps:$4 sm:$0xff]   ;;  %v2165_v9 = vld [vmem:[#allocation6 + $0x48] ss:$12 sps:$4 sm:$0xff]   ;;  %v2166_v10 = vld [vmem:[#allocation6 + $0x64] ss:$12 sps:$4 sm:$0xff]  }
  0x72   :  { %285 = vmatprep.subr.bf16.mxu0 %v2157_v4  ;;  %v2178_v11 = vld [vmem:[#allocation6 + $0x8] ss:$12 sps:$4 sm:$0xff]   ;;  %v2179_v12 = vld [vmem:[#allocation6 + $0x20] ss:$12 sps:$4 sm:$0xff]   ;;  %v2171_v15 = vld [vmem:[#allocation6 + $0x78] ss:$12 sps:$4 sm:$0xff]  }
  0x73   :  { %1897 = vmatpush3.bf16.msra.mxu1 %v2178_v11  ;;  %v2168_v13 = vld [vmem:[#allocation6 + $0x60] ss:$12 sps:$4 sm:$0xff]   ;;  %v2169_v14 = vld [vmem:[#allocation6 + $0x7c] ss:$12 sps:$4 sm:$0xff]   ;;  %v2180_v16 = vld [vmem:[#allocation6 + $0x38] ss:$12 sps:$4 sm:$0xff]  }
  0x74   :  { %1898 = vmatprep.subr.bf16.mxu1 %v2411_v1  ;;  %v2172_v17 = vld [vmem:[#allocation6 + $0x94] ss:$12 sps:$4 sm:$0xff]   ;;  %v2181_v18 = vld [vmem:[#allocation6 + $0x50] ss:$12 sps:$4 sm:$0xff]   ;;  %v2175_v20 = vld [vmem:[#allocation6 + $0xac] ss:$12 sps:$4 sm:$0xff]  }
  0x75   :  { %286 = vmatpush1.bf16.msra.mxu0 %v2159_v5  ;;  %v2174_v19 = vld [vmem:[#allocation6 + $0x90] ss:$12 sps:$4 sm:$0xff]   ;;  %v2182_v21 = vld [vmem:[#allocation6 + $0x68] ss:$12 sps:$4 sm:$0xff]   ;;  %v2183_v25 = vld [vmem:[#allocation6 + $0x80] ss:$12 sps:$4 sm:$0xff]  }
  0x76   :  { %287 = vmatprep.subr.bf16.mxu0 %v2160_v6  ;;  %v2177_v22 = vld [vmem:[#allocation6 + $0xa8] ss:$12 sps:$4 sm:$0xff]   ;;  %v121_v24 = vld [vmem:[#allocation3 + $0x8] sm:$0xff]  ;;  %v2573_v32 = vld [vmem:[#allocation8] sm:$0xff]  ;;  %vm438_vm1 = vcmask 1043456   ;;  %vm434_vm2 = vcmask 64512  }
  0x77   :  { %1899 = vmatpush3.bf16.msra.mxu1 %v2179_v12  ;;  %v122_v26 = vpack.c.bf16 %v121_v24, %v120_v23  ;;  %v2184_v27 = vld [vmem:[#allocation6 + $0x98] ss:$12 sps:$4 sm:$0xff]   ;;  %v2185_v28 = vld [vmem:[#allocation6 + $0xb0] ss:$12 sps:$4 sm:$0xff]   ;;  %v483_v29 = vld [vmem:[#allocation8 + $0x8] sm:$0xff]  ;;  %s2413_s21 = smov [#allocation14]  }
  0x78   :  { %1900 = vmatprep.subr.bf16.mxu1 %v2411_v1  ;;  %v2581_v38 = vld [vmem:[%s2995_s6] sm:$0xf]  ;;  %v2610_v52 = vld [vmem:[%s2996_s7 + $0x8] sm:$0xff]   ;;  %v2615_v53 = vld [vmem:[%s2996_s7 + $0x10] sm:$0xff]   ;;  %s1673_s27 = sshll.u32 %s2413_s21, 4  ;;  %s1674_s27 = int_to_ptr.vmem [resolvable:$true] %s1673_s27 }
  0x79   :  { %288 = vmatpush1.bf16.msra.mxu0 %v2162_v7  ;;  %v2587_v39 = vsel %vm438_vm1, %v2581_v38, 0  ;;  %v432_v40 = vld [vmem:[%s2994_s5] sm:$0xff]  ;;  %v2625_v54 = vld [vmem:[%s2996_s7 + $0x18] sm:$0xff]   ;;  %v2639_v56 = vld [vmem:[%s2996_s7 + $0x28] sm:$0xff]   ;;  %p2371_p7 = scmp.lt.s32.totalorder %s1674_s27, %s1674_s27 }
  0x7a   :  { %289 = vmatprep.subr.bf16.mxu0 %v2163_v8  ;;  %v484_v42 = vld [vmem:[#allocation8 + $0x10] sm:$0xff]  ;;  %v433_v43 = vpack.c.bf16 %v432_v40, %v432_v40  ;;  %v2644_v57 = vld [vmem:[%s2996_s7 + $0x30] sm:$0xff]   ;;  %v2653_v58 = vld [vmem:[%s2996_s7 + $0x38] sm:$0xff]  }
  0x7b   :  { %1901 = vmatpush3.bf16.msra.mxu1 %v2180_v16  ;;  %v2599_v46 = vld [vmem:[%s2996_s7] sm:$0xff]  }
  0x7c   :  { %1902 = vmatprep.subr.bf16.mxu1 %v2411_v1  ;;  %v2630_v55 = vld [vmem:[%s2996_s7 + $0x20] sm:$0xff]  }
  0x7d   :  { %290 = vmatpush1.bf16.msra.mxu0 %v2165_v9 }
  0x7e   :  { %291 = vmatprep.subr.bf16.mxu0 %v2166_v10 }
  0x7f   :  { %1903 = vmatpush3.bf16.msra.mxu1 %v2181_v18 }
  0x80   :  { %1904 = vmatprep.subr.bf16.mxu1 %v2411_v1 }
  0x81   :  { %292 = vmatpush1.bf16.msra.mxu0 %v2168_v13 }
  0x82   :  { %293 = vmatprep.subr.bf16.mxu0 %v2169_v14 }
  0x83   :  { %1905 = vmatpush3.bf16.msra.mxu1 %v2182_v21 }
  0x84   :  { %1906 = vmatprep.subr.bf16.mxu1 %v2411_v1 }
  0x85   :  { %294 = vmatpush1.bf16.msra.mxu0 %v2171_v15 }
  0x86   :  { %295 = vmatprep.subr.bf16.mxu0 %v2172_v17 }
  0x87   :  { %1907 = vmatpush3.bf16.msra.mxu1 %v2183_v25 }
  0x88   :  { %1908 = vmatprep.subr.bf16.mxu1 %v2411_v1 }
  0x89   :  { %296 = vmatpush1.bf16.msra.mxu0 %v2174_v19 }
  0x8a   :  { %297 = vmatprep.subr.bf16.mxu0 %v2175_v20 }
  0x8b   :  { %1909 = vmatpush3.bf16.msra.mxu1 %v2184_v27 }
  0x8c   :  { %1910 = vmatprep.subr.bf16.mxu1 %v2411_v1 }
  0x8d   :  { %298 = vmatpush1.bf16.msra.mxu0 %v2177_v22 }
  0x8e   :  { %1916 = vmatprep.subr.bf16.mxu0 %v2411_v1 }
  0x8f   :  { %1911 = vmatpush3.bf16.msra.mxu1 %v2185_v28 }
  0x90   :  { %316 = vmatmul.mubr.bf16.vlgmr.msra.gmra.mrb[0].mxu0 %v122_v26  ;;  %2134 = vmatprep.subr.msk.bf16.mxu1 %vm438_vm1, %v2581_v38 }
  0x91   :  { %1918 = vmatprep.mubr.msk.bf16.mxu0 %vm2412_vm0, %v2411_v1  ;;  %1917 = vmatpush3.bf16.msra.mxu0 %v2587_v39 }
  0x92   :  { %1913 = vmatmul.mubr.bf16.vlgmr.msra.gmra.mrb[0].mxu1 %v122_v26 }
  0x93   :  { %1923 = vmatpush3.bf16.msra.mxu1 %v2587_v39 }
  0x94   :  { %1958 = vmatprep.subr.bf16.mxu1 %v2411_v1 }
  0x98   :  { %1919 = vmatmul.mubr.msk.bf16.vlgmr.msra.gmra.mrb[4].mxu0 %vm434_vm2, %v433_v43 }
  0x99   :  { %1942 = vmatprep.mubr.msk.bf16.mxu0 %vm434_vm2, %v2599_v46 }
 0x163   :  { %v2571_v30 = vpop.f32.mrb[0].mxu0 }
 0x164   :  { %v319_v31 = vpop.f32.mrb[1].mxu0 }
 0x165   :  { %v321_v33 = vpop.f32.mrb[2].mxu0  ;;  %v486_v34 = vadd.f32 %v483_v29, %v319_v31  ;;  %v360_v41 = vpop.f32.mrb[0].mxu1 }
 0x166   :  { %v2576_v35 = vadd.f32 %v2573_v32, %v321_v33  ;;  %v323_v36 = vpop.f32.mrb[3].mxu0  ;;  %v487_v44 = vadd.f32 %v484_v42, %v360_v41  ;;  %v1914_v45 = vpop.f32.mrb[1].mxu1 }
 0x167   :  { %489 = vxpose.xlu0.b32.start.end [1/1] (short) %v486_v34, 128  ;;  %v1123_v37 = vadd.f32 %v483_v29, %v323_v36  ;;  %v363_v47 = vpop.f32.mrb[2].mxu1 }
 0x168   :  { %v529_v48 = vpack.c.bf16 %v487_v44, %v487_v44  ;;  %v2601_v49 = vadd.f32 %v484_v42, %v363_v47  ;;  %v1915_v50 = vpop.f32.mrb[3].mxu1 }
 0x169   :  { %1126 = vxpose.xlu1.b32.start.end [1/1] (short) %v1123_v37, 128 }
 0x16a   :  { %v780_v51 = vsel %vm438_vm1, %v529_v48, 0  ;;  %2135 = vmatprep.subr.msk.bf16.mxu0 %vm438_vm1, %v529_v48 }
 0x16b   :  { %1941 = vmatpush3.bf16.msra.mxu0 %v780_v51  ;;  %v2669_v20 = vpop.f32.mrb[4].mxu0 }
 0x16c   :  { %1978 = vmatprep.subr.bf16.mxu0 %v2411_v1  ;;  %v1920_v21 = vpop.f32.mrb[5].mxu0 }
 0x16d   :  { %v479_v22 = vpop.f32.mrb[6].mxu0 }
 0x16e   :  { %1943 = vmatmul.mubr.msk.bf16.vlgmr.msra.gmra.mrb[8].mxu0 %vm434_vm2, %v2610_v52  ;;  %v1921_v23 = vpop.f32.mrb[7].mxu0 }
 0x16f   :  { %1946 = vmatprep.mubr.msk.bf16.mxu0 %vm434_vm2, %v2615_v53  ;;  %v2735_v23 = vld [vmem:[#allocation9 + $0x20] sm:$0xff]  }
 0x176   :  { %1947 = vmatmul.mubr.msk.bf16.gmra.mrb[12].mxu0 %vm434_vm2, %v2625_v54 }
 0x177   :  { %1950 = vmatprep.mubr.msk.bf16.mxu0 %vm434_vm2, %v2630_v55 }
 0x17e   :  { %1951 = vmatmul.mubr.msk.bf16.gmra.mrb[16].mxu0 %vm434_vm2, %v2639_v56 }
 0x17f   :  { %1954 = vmatprep.mubr.msk.bf16.mxu0 %vm434_vm2, %v2644_v57 }
 0x186   :  { %1955 = vmatmul.mubr.msk.bf16.gmra.mrb[20].mxu0 %vm434_vm2, %v2653_v58 }
 0x187   :  { %1994 = vmatprep.mubr.msk.bf16.mxu0 %vm2412_vm0, %v2411_v1 }
 0x1e7   :  { %v505_v59 = vpop.trf.xlu0 }
 0x1eb   :  { %v506_v60 = vpop.trf.xlu0 }
 0x1ec   :  { %v521_v61 = vpack.c.bf16 %v506_v60, %v505_v59 }
 0x1ee   :  { %1924 = vmatprep.mubr.msk.bf16.mxu1 %vm434_vm2, %v521_v61 }
 0x1ef   :  { %v507_v62 = vpop.trf.xlu0 }
 0x1f3   :  { %v508_v63 = vpop.trf.xlu0 }
 0x1f4   :  { %v522_v0 = vpack.c.bf16 %v508_v63, %v507_v62 }
 0x1f6   :  { %1925 = vmatmul.mubr.msk.bf16.vlgmr.msra.gmra.mrb[4].mxu1 %vm434_vm2, %v522_v0 }
 0x1f7   :  { %v509_v2 = vpop.trf.xlu0 }
 0x1fb   :  { %v510_v3 = vpop.trf.xlu0 }
 0x1fc   :  { %v523_v4 = vpack.c.bf16 %v510_v3, %v509_v2  ;;  %v2719_v2 = vld [vmem:[#allocation9] sm:$0xff]  }
 0x1fe   :  { %1928 = vmatprep.mubr.msk.bf16.mxu1 %vm434_vm2, %v523_v4 }
 0x1ff   :  { %v511_v5 = vpop.trf.xlu0 }
 0x203   :  { %v512_v6 = vpop.trf.xlu0 }
 0x204   :  { %v524_v7 = vpack.c.bf16 %v512_v6, %v511_v5  ;;  %v2721_v6 = vld [vmem:[#allocation9 + $0x8] sm:$0xff]  }
 0x206   :  { %1929 = vmatmul.mubr.msk.bf16.gmra.mrb[8].mxu1 %vm434_vm2, %v524_v7 }
 0x207   :  { %v513_v8 = vpop.trf.xlu0 }
 0x20b   :  { %v514_v9 = vpop.trf.xlu0 }
 0x20c   :  { %v525_v10 = vpack.c.bf16 %v514_v9, %v513_v8 }
 0x20e   :  { %1932 = vmatprep.mubr.msk.bf16.mxu1 %vm434_vm2, %v525_v10 }
 0x20f   :  { %v515_v11 = vpop.trf.xlu0 }
 0x213   :  { %v516_v12 = vpop.trf.xlu0 }
 0x214   :  { %v526_v13 = vpack.c.bf16 %v516_v12, %v515_v11  ;;  %v2727_v12 = vld [vmem:[#allocation9 + $0x10] sm:$0xff]  }
 0x216   :  { %1933 = vmatmul.mubr.msk.bf16.gmra.mrb[12].mxu1 %vm434_vm2, %v526_v13 }
 0x217   :  { %v517_v14 = vpop.trf.xlu0 }
 0x21b   :  { %v518_v15 = vpop.trf.xlu0 }
 0x21c   :  { %v527_v16 = vpack.c.bf16 %v518_v15, %v517_v14 }
 0x21e   :  { %1936 = vmatprep.mubr.msk.bf16.mxu1 %vm434_vm2, %v527_v16  ;;  %v2729_v16 = vld [vmem:[#allocation9 + $0x18] sm:$0xff]  }
 0x21f   :  { %v519_v17 = vpop.trf.xlu0 }
 0x223   :  { %v520_v18 = vpop.trf.xlu0 }
 0x224   :  { %v528_v19 = vpack.c.bf16 %v520_v18, %v519_v17 }
 0x226   :  { %1937 = vmatmul.mubr.msk.bf16.gmra.mrb[16].mxu1 %vm434_vm2, %v528_v19 }
 0x227   :  { %1974 = vmatprep.mubr.msk.bf16.mxu1 %vm2412_vm0, %v2411_v1 }
 0x241   :  { %v2671_v24 = vpop.f32.mrb[8].mxu0 }
 0x242   :  { %v2673_v25 = vpop.f32.mrb[9].mxu0 }
 0x243   :  { %v2675_v26 = vpop.f32.mrb[10].mxu0 }
 0x244   :  { %v880_v27 = vpack.c.bf16 %v2675_v26, %v2671_v24  ;;  %v2679_v28 = vpop.f32.mrb[11].mxu0  ;;  %v2781_v26 = vld [vmem:[#allocation11 + $0x20] sm:$0xff]  }
 0x245   :  { %v879_v29 = vpack.c.bf16 %v2679_v28, %v2673_v25  ;;  %v2770_v25 = vld [vmem:[#allocation11 + $0x18] sm:$0xff]  }
 0x249   :  { %v2683_v31 = vpop.f32.mrb[12].mxu0 }
 0x24a   :  { %v2685_v33 = vpop.f32.mrb[13].mxu0 }
 0x24b   :  { %v2687_v34 = vpop.f32.mrb[14].mxu0 }
 0x24c   :  { %v882_v36 = vpack.c.bf16 %v2687_v34, %v2683_v31  ;;  %v2691_v37 = vpop.f32.mrb[15].mxu0  ;;  %v2798_v34 = vld [vmem:[#allocation11 + $0x38] sm:$0xff]  }
 0x24d   :  { %v881_v40 = vpack.c.bf16 %v2691_v37, %v2685_v33  ;;  %v2795_v33 = vld [vmem:[#allocation11 + $0x30] sm:$0xff]  }
 0x24e   :  { %v938_v24 = vmul.bf16 %v2770_v25, %v882_v36 }
 0x251   :  { %v2695_v41 = vpop.f32.mrb[16].mxu0 }
 0x252   :  { %v2697_v42 = vpop.f32.mrb[17].mxu0 }
 0x253   :  { %v2699_v43 = vpop.f32.mrb[18].mxu0 }
 0x254   :  { %v884_v44 = vpack.c.bf16 %v2699_v43, %v2695_v41  ;;  %v2703_v45 = vpop.f32.mrb[19].mxu0  ;;  %v2816_v41 = vld [vmem:[#allocation12] sm:$0xff]   ;;  %v2823_v43 = vld [vmem:[#allocation12 + $0x10] sm:$0xff]  }
 0x255   :  { %v883_v47 = vpack.c.bf16 %v2703_v45, %v2697_v42  ;;  %1979 = vmatpush3.bf16.msra.mxu0 %v2816_v41  ;;  %v2819_v42 = vld [vmem:[#allocation12 + $0x8] sm:$0xff]  }
 0x256   :  { %1980 = vmatprep.subr.bf16.mxu0 %v2411_v1 }
 0x259   :  { %v2707_v48 = vpop.f32.mrb[20].mxu0  ;;  %1981 = vmatpush3.bf16.msra.mxu0 %v2819_v42 }
 0x25a   :  { %v2709_v50 = vpop.f32.mrb[21].mxu0  ;;  %1982 = vmatprep.subr.bf16.mxu0 %v2411_v1 }
 0x25b   :  { %v2711_v51 = vpop.f32.mrb[22].mxu0 }
 0x25c   :  { %v886_v59 = vpack.c.bf16 %v2711_v51, %v2707_v48  ;;  %v2715_v60 = vpop.f32.mrb[23].mxu0  ;;  %v2833_v51 = vld [vmem:[#allocation12 + $0x20] sm:$0xff]  }
 0x25d   :  { %v885_v61 = vpack.c.bf16 %v2715_v60, %v2709_v50  ;;  %1983 = vmatpush3.bf16.msra.mxu0 %v2823_v43  ;;  %v2840_v60 = vld [vmem:[#allocation12 + $0x30] sm:$0xff]  }
 0x25e   :  { %v942_v37 = vmul.bf16 %v2798_v34, %v886_v59  ;;  %1984 = vmatprep.subr.bf16.mxu0 %v2411_v1  ;;  %v2837_v59 = vld [vmem:[#allocation12 + $0x28] sm:$0xff]  }
 0x25f   :  { %v941_v36 = vmul.bf16 %v2795_v33, %v885_v61  ;;  %v2844_v61 = vld [vmem:[#allocation12 + $0x38] sm:$0xff]  }
 0x2c9   :  { %v1926_v62 = vpop.f32.mrb[4].mxu1 }
 0x2ca   :  { %v588_v63 = vpop.f32.mrb[5].mxu1 }
 0x2cb   :  { %v1927_v0 = vpop.f32.mrb[6].mxu1 }
 0x2cc   :  { %v652_v3 = vpack.c.bf16 %v1927_v0, %v1926_v62  ;;  %v591_v4 = vpop.f32.mrb[7].mxu1 }
 0x2cd   :  { %v651_v5 = vpack.c.bf16 %v591_v4, %v588_v63 }
 0x2ce   :  { %v708_v8 = vmul.bf16 %v2721_v6, %v652_v3  ;;  %v2737_v3 = vld [vmem:[#allocation9 + $0x28] sm:$0xff]  }
 0x2cf   :  { %v707_v7 = vmul.bf16 %v2719_v2, %v651_v5 }
 0x2d1   :  { %1959 = vmatpush3.bf16.msra.mxu1 %v707_v7 }
 0x2d2   :  { %1960 = vmatprep.subr.bf16.mxu1 %v2411_v1 }
 0x2d5   :  { %1961 = vmatpush3.bf16.msra.mxu1 %v708_v8 }
 0x2d6   :  { %1962 = vmatprep.subr.bf16.mxu1 %v2411_v1 }
 0x2d9   :  { %v1930_v9 = vpop.f32.mrb[8].mxu1 }
 0x2da   :  { %v604_v10 = vpop.f32.mrb[9].mxu1 }
 0x2db   :  { %v1931_v11 = vpop.f32.mrb[10].mxu1 }
 0x2dc   :  { %v654_v13 = vpack.c.bf16 %v1931_v11, %v1930_v9  ;;  %v607_v14 = vpop.f32.mrb[11].mxu1 }
 0x2dd   :  { %v653_v15 = vpack.c.bf16 %v607_v14, %v604_v10  ;;  %v2743_v10 = vld [vmem:[#allocation9 + $0x30] sm:$0xff]  }
 0x2de   :  { %v710_v18 = vmul.bf16 %v2729_v16, %v654_v13 }
 0x2df   :  { %v709_v17 = vmul.bf16 %v2727_v12, %v653_v15  ;;  %v2745_v15 = vld [vmem:[#allocation9 + $0x38] sm:$0xff]  }
 0x2e1   :  { %1963 = vmatpush3.bf16.msra.mxu1 %v709_v17 }
 0x2e2   :  { %1964 = vmatprep.subr.bf16.mxu1 %v2411_v1 }
 0x2e5   :  { %1965 = vmatpush3.bf16.msra.mxu1 %v710_v18  ;;  %v2748_v18 = vld [vmem:[#allocation11] sm:$0xff]  }
 0x2e6   :  { %1966 = vmatprep.subr.bf16.mxu1 %v2411_v1 }
 0x2e9   :  { %v1934_v19 = vpop.f32.mrb[12].mxu1 }
 0x2ea   :  { %v620_v21 = vpop.f32.mrb[13].mxu1 }
 0x2eb   :  { %v1935_v22 = vpop.f32.mrb[14].mxu1 }
 0x2ec   :  { %v656_v62 = vpack.c.bf16 %v1935_v22, %v1934_v19  ;;  %v623_v63 = vpop.f32.mrb[15].mxu1  ;;  %v485_v19 = vadd.f32 %v2573_v32, %v2571_v30  ;;  %v2754_v22 = vld [vmem:[#allocation11 + $0x8] sm:$0xff]   ;;  %v2765_v32 = vld [vmem:[#allocation11 + $0x10] sm:$0xff]  }
 0x2ed   :  { %v655_v0 = vpack.c.bf16 %v623_v63, %v620_v21  ;;  %v936_v30 = vmul.bf16 %v2754_v22, %v880_v27  ;;  %v937_v28 = vmul.bf16 %v2765_v32, %v881_v40  ;;  %v2784_v27 = vld [vmem:[#allocation11 + $0x28] sm:$0xff]   ;;  %v2812_v40 = vpack.c.bf16 %v2601_v49, %v2601_v49  ;;  %v2827_v49 = vld [vmem:[#allocation12 + $0x18] sm:$0xff]  }
 0x2ee   :  { %v712_v5 = vmul.bf16 %v2737_v3, %v656_v62  ;;  %v935_v62 = vmul.bf16 %v2748_v18, %v879_v29  ;;  %v488_v63 = vpack.c.bf16 %v485_v19, %v485_v19  ;;  %v939_v29 = vmul.bf16 %v2781_v26, %v883_v47  ;;  %1985 = vmatpush3.bf16.msra.mxu0 %v2827_v49 }
 0x2ef   :  { %v711_v4 = vmul.bf16 %v2735_v23, %v655_v0  ;;  %v940_v31 = vmul.bf16 %v2784_v27, %v884_v44  ;;  %1986 = vmatprep.subr.bf16.mxu0 %v2411_v1  ;;  %v1142_v0 = vpop.trf.xlu1 }
 0x2f1   :  { %1967 = vmatpush3.bf16.msra.mxu1 %v711_v4 }
 0x2f2   :  { %1968 = vmatprep.subr.bf16.mxu1 %v2411_v1  ;;  %1987 = vmatpush3.bf16.msra.mxu0 %v2833_v51 }
 0x2f3   :  { %1988 = vmatprep.subr.bf16.mxu0 %v2411_v1  ;;  %v1143_v4 = vpop.trf.xlu1 }
 0x2f5   :  { %1969 = vmatpush3.bf16.msra.mxu1 %v712_v5 }
 0x2f6   :  { %1970 = vmatprep.subr.bf16.mxu1 %v2411_v1  ;;  %1989 = vmatpush3.bf16.msra.mxu0 %v2837_v59 }
 0x2f7   :  { %1990 = vmatprep.subr.bf16.mxu0 %v2411_v1  ;;  %v1144_v5 = vpop.trf.xlu1 }
 0x2f9   :  { %v1938_v7 = vpop.f32.mrb[16].mxu1 }
 0x2fa   :  { %v636_v8 = vpop.f32.mrb[17].mxu1  ;;  %1991 = vmatpush3.bf16.msra.mxu0 %v2840_v60 }
 0x2fb   :  { %v1939_v9 = vpop.f32.mrb[18].mxu1  ;;  %1992 = vmatprep.subr.bf16.mxu0 %v2411_v1 }
 0x2fc   :  { %v658_v11 = vpack.c.bf16 %v1939_v9, %v1938_v7  ;;  %v639_v13 = vpop.f32.mrb[19].mxu1  ;;  %v1145_v7 = vpop.trf.xlu1 }
 0x2fd   :  { %v657_v14 = vpack.c.bf16 %v639_v13, %v636_v8 }
 0x2fe   :  { %v714_v21 = vmul.bf16 %v2745_v15, %v658_v11  ;;  %1993 = vmatpush3.bf16.msra.mxu0 %v2844_v61 }
 0x2ff   :  { %v713_v17 = vmul.bf16 %v2743_v10, %v657_v14  ;;  %2136 = vmatprep.subr.msk.bf16.mxu0 %vm438_vm1, %v2581_v38 }
 0x300   :  { %v1146_v8 = vpop.trf.xlu1 }
 0x301   :  { %1971 = vmatpush3.bf16.msra.mxu1 %v713_v17 }
 0x302   :  { %1972 = vmatprep.subr.bf16.mxu1 %v2411_v1 }
 0x304   :  { %v1147_v9 = vpop.trf.xlu1 }
 0x305   :  { %1973 = vmatpush3.bf16.msra.mxu1 %v714_v21 }
 0x306   :  { %1998 = vmatprep.subr.bf16.mxu1 %v2411_v1 }
 0x308   :  { %1975 = vmatmul.mubr.bf16.vlgmr.msra.gmra.mrb[20].mxu1 %v488_v63  ;;  %v1148_v11 = vpop.trf.xlu1 }
 0x309   :  { %1999 = vmatpush3.bf16.msra.mxu1 %v935_v62  ;;  %2014 = vmatprep.mubr.msk.bf16.mxu1 %vm2412_vm0, %v2411_v1 }
 0x30a   :  { %2000 = vmatprep.subr.bf16.mxu1 %v2411_v1 }
 0x30c   :  { %v1149_v13 = vpop.trf.xlu1 }
 0x30d   :  { %2001 = vmatpush3.bf16.msra.mxu1 %v936_v30 }
 0x30e   :  { %2002 = vmatprep.subr.bf16.mxu1 %v2411_v1 }
 0x310   :  { %v1150_v21 = vpop.trf.xlu1 }
 0x311   :  { %2003 = vmatpush3.bf16.msra.mxu1 %v937_v28 }
 0x312   :  { %2004 = vmatprep.subr.bf16.mxu1 %v2411_v1 }
 0x314   :  { %v1151_v62 = vpop.trf.xlu1 }
 0x315   :  { %2005 = vmatpush3.bf16.msra.mxu1 %v938_v24  ;;  %v1158_v24 = vpack.c.bf16 %v1143_v4, %v1142_v0 }
 0x316   :  { %2006 = vmatprep.subr.bf16.mxu1 %v2411_v1 }
 0x318   :  { %v1152_v30 = vpop.trf.xlu1 }
 0x319   :  { %2007 = vmatpush3.bf16.msra.mxu1 %v939_v29  ;;  %v1159_v29 = vpack.c.bf16 %v1145_v7, %v1144_v5 }
 0x31a   :  { %2008 = vmatprep.subr.bf16.mxu1 %v2411_v1 }
 0x31c   :  { %v1153_v38 = vpop.trf.xlu1 }
 0x31d   :  { %2009 = vmatpush3.bf16.msra.mxu1 %v940_v31  ;;  %v1160_v31 = vpack.c.bf16 %v1147_v9, %v1146_v8 }
 0x31e   :  { %2010 = vmatprep.subr.bf16.mxu1 %v2411_v1 }
 0x321   :  { %2011 = vmatpush3.bf16.msra.mxu1 %v941_v36  ;;  %v1154_v36 = vpop.trf.xlu1 }
 0x322   :  { %2012 = vmatprep.subr.bf16.mxu1 %v2411_v1 }
 0x325   :  { %2013 = vmatpush3.bf16.msra.mxu1 %v942_v37  ;;  %v1161_v37 = vpack.c.bf16 %v1149_v13, %v1148_v11 }
 0x326   :  { %2137 = vmatprep.subr.msk.bf16.mxu1 %vm438_vm1, %v2812_v40 }
 0x3db   :  { %v977_v44 = vpop.f32.mrb[20].mxu1 }
 0x3dc   :  { %v978_v45 = vadd.f32 %v977_v44, %v2669_v20  ;;  %v1976_v47 = vpop.f32.mrb[21].mxu1  ;;  %v1162_v44 = vpack.c.bf16 %v1151_v62, %v1150_v21 }
 0x3dd   :  { %v980_v48 = vpop.f32.mrb[22].mxu1  ;;  %v1163_v47 = vpack.c.bf16 %v1153_v38, %v1152_v30 }
 0x3de   :  { %v1977_v50 = vpop.f32.mrb[23].mxu1  ;;  %983 = vmax.xlane.f32.xlu0 %v978_v45 }
 0x46b   :  { %v984_v14 = vpop.xlane.xlu0 %983 }
 0x46c   :  { %v985_v17 = vsub.f32 %v978_v45, %v984_v14  ;;  %v1155_v45 = vpop.trf.xlu1 }
 0x46d   :  { %v1164_v48 = vpack.c.bf16 %v1155_v45, %v1154_v36 }
 0x46e   :  { %v986_v19 = vmul.f32 1.442695, %v985_v17 }
 0x470   :  { %2226 = vpow2.f32 %v986_v19 }
 0x47a   :  { %v2227_v63 = vpop.eup %2226 }
 0x47b   :  { %v988_v28 = vpack.c.bf16 %v2227_v63, %v2227_v63 }
 0x47d   :  { %1995 = vmatmul.mubr.bf16.vlgmr.msra.gmra.mrb[24].mxu0 %v988_v28 }
 0x47e   :  { %2019 = vmatpush3.bf16.msra.mxu0 %v2587_v39  ;;  %2020 = vmatprep.mubr.msk.bf16.mxu0 %vm434_vm2, %v1158_v24  ;;  %v1156_v39 = vpop.trf.xlu1 }
 0x47f   :  { %2054 = vmatprep.subr.bf16.mxu0 %v2411_v1 }
 0x482   :  { %v1157_v50 = vpop.trf.xlu1 }
 0x483   :  { %v1165_v0 = vpack.c.bf16 %v1157_v50, %v1156_v39 }
 0x485   :  { %2021 = vmatmul.mubr.msk.bf16.vlgmr.msra.gmra.mrb[28].mxu0 %vm434_vm2, %v1159_v29 }
 0x486   :  { %2024 = vmatprep.mubr.msk.bf16.mxu0 %vm434_vm2, %v1160_v31  ;;  %v1305_v31 = vsel %vm438_vm1, %v2812_v40, 0 }
 0x48d   :  { %2025 = vmatmul.mubr.msk.bf16.gmra.mrb[32].mxu0 %vm434_vm2, %v1161_v37 }
 0x48e   :  { %2028 = vmatprep.mubr.msk.bf16.mxu0 %vm434_vm2, %v1162_v44 }
 0x495   :  { %2029 = vmatmul.mubr.msk.bf16.gmra.mrb[36].mxu0 %vm434_vm2, %v1163_v47 }
 0x496   :  { %2032 = vmatprep.mubr.msk.bf16.mxu0 %vm434_vm2, %v1164_v48 }
 0x49d   :  { %2033 = vmatmul.mubr.msk.bf16.gmra.mrb[40].mxu0 %vm434_vm2, %v1165_v0 }
 0x49e   :  { %2070 = vmatprep.mubr.msk.bf16.mxu0 %vm2412_vm0, %v2411_v1 }
 0x550   :  { %v1071_v4 = vpop.f32.mrb[24].mxu0 }
 0x551   :  { %v1077_v5 = vmax.f32 %v1071_v4, 1e-20  ;;  %v1996_v7 = vpop.f32.mrb[25].mxu0 }
 0x552   :  { %v1074_v8 = vpop.f32.mrb[26].mxu0 }
 0x553   :  { %2228 = vrcp.f32 %v1077_v5  ;;  %v1997_v9 = vpop.f32.mrb[27].mxu0 }
 0x558   :  { %v2022_v11 = vpop.f32.mrb[28].mxu0 }
 0x559   :  { %v1225_v13 = vpop.f32.mrb[29].mxu0 }
 0x55a   :  { %v2023_v14 = vpop.f32.mrb[30].mxu0 }
 0x55b   :  { %v1289_v17 = vpack.c.bf16 %v2023_v14, %v2022_v11  ;;  %v1228_v19 = vpop.f32.mrb[31].mxu0 }
 0x55c   :  { %v1288_v21 = vpack.c.bf16 %v1228_v19, %v1225_v13 }
 0x55d   :  { %v2229_v62 = vpop.eup %2228  ;;  %v1297_v36 = vmul.bf16 %v2721_v6, %v1289_v17 }
 0x55e   :  { %v1296_v30 = vmul.bf16 %v2719_v2, %v1288_v21  ;;  %v1079_v28 = vmul.f32 %v2229_v62, %v2227_v63 }
 0x560   :  { %v2026_v24 = vpop.f32.mrb[32].mxu0  ;;  %2055 = vmatpush3.bf16.msra.mxu0 %v1296_v30  ;;  %v1080_v38 = vpack.c.bf16 %v1079_v28, %v1079_v28 }
 0x561   :  { %v1241_v29 = vpop.f32.mrb[33].mxu0  ;;  %2056 = vmatprep.subr.bf16.mxu0 %v2411_v1 }
 0x562   :  { %2015 = vmatmul.mubr.bf16.vlgmr.msra.gmra.mrb[24].mxu1 %v1080_v38  ;;  %v2027_v37 = vpop.f32.mrb[34].mxu0 }
 0x563   :  { %v1291_v44 = vpack.c.bf16 %v2027_v37, %v2026_v24  ;;  %2037 = vmatpush3.bf16.msra.mxu1 %v1305_v31  ;;  %v1244_v45 = vpop.f32.mrb[35].mxu0  ;;  %2038 = vmatprep.mubr.msk.bf16.mxu1 %vm434_vm2, %v2599_v46 }
 0x564   :  { %v1290_v2 = vpack.c.bf16 %v1244_v45, %v1241_v29  ;;  %2057 = vmatpush3.bf16.msra.mxu0 %v1297_v36  ;;  %2074 = vmatprep.subr.bf16.mxu1 %v2411_v1 }
 0x565   :  { %2058 = vmatprep.subr.bf16.mxu0 %v2411_v1  ;;  %v1299_v6 = vmul.bf16 %v2729_v16, %v1291_v44 }
 0x566   :  { %v1298_v63 = vmul.bf16 %v2727_v12, %v1290_v2 }
 0x568   :  { %v2030_v39 = vpop.f32.mrb[36].mxu0  ;;  %2059 = vmatpush3.bf16.msra.mxu0 %v1298_v63 }
 0x569   :  { %v1257_v40 = vpop.f32.mrb[37].mxu0  ;;  %2060 = vmatprep.subr.bf16.mxu0 %v2411_v1 }
 0x56a   :  { %v2031_v47 = vpop.f32.mrb[38].mxu0  ;;  %2039 = vmatmul.mubr.msk.bf16.vlgmr.msra.gmra.mrb[28].mxu1 %vm434_vm2, %v2610_v52 }
 0x56b   :  { %v1293_v46 = vpack.c.bf16 %v2031_v47, %v2030_v39  ;;  %v1260_v48 = vpop.f32.mrb[39].mxu0  ;;  %2042 = vmatprep.mubr.msk.bf16.mxu1 %vm434_vm2, %v2615_v53  ;;  %2075 = vmatpush3.bf16.msra.mxu1 %v2816_v41  ;;  %v2220_v47 = vld [vmem:[%s2992_s3 + $0x10] sm:$0xff]  }
 0x56c   :  { %v1292_v50 = vpack.c.bf16 %v1260_v48, %v1257_v40  ;;  %2061 = vmatpush3.bf16.msra.mxu0 %v1299_v6  ;;  %2076 = vmatprep.subr.bf16.mxu1 %v2411_v1  ;;  %v2222_v48 = vld [vmem:[%s2992_s3 + $0x20] sm:$0xff]  }
 0x56d   :  { %2062 = vmatprep.subr.bf16.mxu0 %v2411_v1  ;;  %v1301_v53 = vmul.bf16 %v2737_v3, %v1293_v46  ;;  %v2221_v46 = vld [vmem:[%s2992_s3 + $0x18] sm:$0xff]  }
 0x56e   :  { %v1300_v12 = vmul.bf16 %v2735_v23, %v1292_v50  ;;  %v2223_v50 = vld [vmem:[%s2992_s3 + $0x28] sm:$0xff]  }
 0x56f   :  { %2077 = vmatpush3.bf16.msra.mxu1 %v2819_v42 }
 0x570   :  { %v2034_v16 = vpop.f32.mrb[40].mxu0  ;;  %2063 = vmatpush3.bf16.msra.mxu0 %v1300_v12  ;;  %2078 = vmatprep.subr.bf16.mxu1 %v2411_v1  ;;  %v2224_v12 = vld [vmem:[%s2992_s3 + $0x30] sm:$0xff]  }
 0x571   :  { %v1273_v52 = vpop.f32.mrb[41].mxu0  ;;  %2064 = vmatprep.subr.bf16.mxu0 %v2411_v1 }
 0x572   :  { %v2035_v41 = vpop.f32.mrb[42].mxu0  ;;  %2043 = vmatmul.mubr.msk.bf16.gmra.mrb[32].mxu1 %vm434_vm2, %v2625_v54 }
 0x573   :  { %v1295_v0 = vpack.c.bf16 %v2035_v41, %v2034_v16  ;;  %v1276_v4 = vpop.f32.mrb[43].mxu0  ;;  %2046 = vmatprep.mubr.msk.bf16.mxu1 %vm434_vm2, %v2630_v55  ;;  %2079 = vmatpush3.bf16.msra.mxu1 %v2823_v43  ;;  %v1125_v55 = vpack.c.bf16 %v2576_v35, %v2576_v35 }
 0x574   :  { %v1294_v23 = vpack.c.bf16 %v1276_v4, %v1273_v52  ;;  %2065 = vmatpush3.bf16.msra.mxu0 %v1301_v53  ;;  %2080 = vmatprep.subr.bf16.mxu1 %v2411_v1 }
 0x575   :  { %2066 = vmatprep.subr.bf16.mxu0 %v2411_v1  ;;  %v1303_v54 = vmul.bf16 %v2745_v15, %v1295_v0 }
 0x576   :  { %v1302_v42 = vmul.bf16 %v2743_v10, %v1294_v23 }
 0x577   :  { %2081 = vmatpush3.bf16.msra.mxu1 %v2827_v49 }
 0x578   :  { %2067 = vmatpush3.bf16.msra.mxu0 %v1302_v42  ;;  %2082 = vmatprep.subr.bf16.mxu1 %v2411_v1 }
 0x579   :  { %2068 = vmatprep.subr.bf16.mxu0 %v2411_v1 }
 0x57a   :  { %2047 = vmatmul.mubr.msk.bf16.gmra.mrb[36].mxu1 %vm434_vm2, %v2639_v56 }
 0x57b   :  { %2050 = vmatprep.mubr.msk.bf16.mxu1 %vm434_vm2, %v2644_v57  ;;  %2083 = vmatpush3.bf16.msra.mxu1 %v2833_v51 }
 0x57c   :  { %2069 = vmatpush3.bf16.msra.mxu0 %v1303_v54  ;;  %2084 = vmatprep.subr.bf16.mxu1 %v2411_v1  ;;  %v2225_v54 = vld [vmem:[%s2992_s3 + $0x38] sm:$0xff]  }
 0x57d   :  { %2094 = vmatprep.subr.bf16.mxu0 %v2411_v1 }
 0x57f   :  { %2071 = vmatmul.mubr.bf16.vlgmr.msra.gmra.mrb[44].mxu0 %v1125_v55  ;;  %2085 = vmatpush3.bf16.msra.mxu1 %v2837_v59 }
 0x580   :  { %2086 = vmatprep.subr.bf16.mxu1 %v2411_v1  ;;  %2110 = vmatprep.mubr.msk.bf16.mxu0 %vm2412_vm0, %v2411_v1 }
 0x582   :  { %2051 = vmatmul.mubr.msk.bf16.gmra.mrb[40].mxu1 %vm434_vm2, %v2653_v58 }
 0x583   :  { %2087 = vmatpush3.bf16.msra.mxu1 %v2840_v60  ;;  %2090 = vmatprep.mubr.msk.bf16.mxu1 %vm2412_vm0, %v2411_v1 }
 0x584   :  { %2088 = vmatprep.subr.bf16.mxu1 %v2411_v1 }
 0x587   :  { %2089 = vmatpush3.bf16.msra.mxu1 %v2844_v61 }
 0x588   :  { %2114 = vmatprep.subr.bf16.mxu1 %v2411_v1 }
 0x635   :  { %v2919_v35 = vpop.f32.mrb[24].mxu1 }
 0x636   :  { %v2016_v56 = vpop.f32.mrb[25].mxu1 }
 0x637   :  { %v1118_v57 = vpop.f32.mrb[26].mxu1 }
 0x638   :  { %v2017_v3 = vpop.f32.mrb[27].mxu1 }
 0x63d   :  { %v2040_v51 = vpop.f32.mrb[28].mxu1 }
 0x63e   :  { %v1341_v59 = vpop.f32.mrb[29].mxu1 }
 0x63f   :  { %v2041_v60 = vpop.f32.mrb[30].mxu1 }
 0x640   :  { %v1405_v5 = vpack.c.bf16 %v2041_v60, %v2040_v51  ;;  %v1344_v7 = vpop.f32.mrb[31].mxu1 }
 0x641   :  { %v1404_v61 = vpack.c.bf16 %v1344_v7, %v1341_v59 }
 0x642   :  { %v1413_v19 = vmul.bf16 %v2754_v22, %v1405_v5 }
 0x643   :  { %v1412_v11 = vmul.bf16 %v2748_v18, %v1404_v61 }
 0x645   :  { %v2044_v8 = vpop.f32.mrb[32].mxu1  ;;  %2095 = vmatpush3.bf16.msra.mxu0 %v1412_v11 }
 0x646   :  { %v1357_v9 = vpop.f32.mrb[33].mxu1  ;;  %2096 = vmatprep.subr.bf16.mxu0 %v2411_v1 }
 0x647   :  { %v2045_v13 = vpop.f32.mrb[34].mxu1 }
 0x648   :  { %v1407_v14 = vpack.c.bf16 %v2045_v13, %v2044_v8  ;;  %v1360_v17 = vpop.f32.mrb[35].mxu1 }
 0x649   :  { %2097 = vmatpush3.bf16.msra.mxu0 %v1413_v19 }
 0x64a   :  { %2098 = vmatprep.subr.bf16.mxu0 %v2411_v1  ;;  %v1415_v44 = vmul.bf16 %v2770_v25, %v1407_v14 }
 0x64d   :  { %v2048_v21 = vpop.f32.mrb[36].mxu1 }
 0x64e   :  { %v1373_v62 = vpop.f32.mrb[37].mxu1 }
 0x64f   :  { %v2049_v30 = vpop.f32.mrb[38].mxu1 }
 0x650   :  { %v1409_v28 = vpack.c.bf16 %v2049_v30, %v2048_v21  ;;  %v1376_v24 = vpop.f32.mrb[39].mxu1 }
 0x651   :  { %v1408_v29 = vpack.c.bf16 %v1376_v24, %v1373_v62 }
 0x652   :  { %v1454_v10 = vpop.f32.mrb[44].mxu0 }
 0x653   :  { %v1455_v15 = vadd.f32 %v1454_v10, %v2669_v20  ;;  %v2072_v58 = vpop.f32.mrb[45].mxu0  ;;  %v1406_v20 = vpack.c.bf16 %v1360_v17, %v1357_v9  ;;  %v1416_v2 = vmul.bf16 %v2781_v26, %v1408_v29  ;;  %v1777_v10 = vld [vmem:[%s2993_s4] ss:$0 sm:$0xff] }
 0x654   :  { %v1457_v43 = vpop.f32.mrb[46].mxu0 }
 0x655   :  { %1460 = vmax.xlane.f32.xlu1 %v1455_v15  ;;  %v2073_v49 = vpop.f32.mrb[47].mxu0  ;;  %v1414_v38 = vmul.bf16 %v2765_v32, %v1406_v20  ;;  %v2052_v31 = vpop.f32.mrb[40].mxu1  ;;  %v1417_v32 = vmul.bf16 %v2784_v27, %v1409_v28 }
 0x656   :  { %v1389_v18 = vpop.f32.mrb[41].mxu1 }
 0x657   :  { %v2053_v36 = vpop.f32.mrb[42].mxu1  ;;  %2099 = vmatpush3.bf16.msra.mxu0 %v1414_v38 }
 0x658   :  { %v1411_v37 = vpack.c.bf16 %v2053_v36, %v2052_v31  ;;  %v1392_v22 = vpop.f32.mrb[43].mxu1  ;;  %2100 = vmatprep.subr.bf16.mxu0 %v2411_v1 }
 0x659   :  { %v1410_v45 = vpack.c.bf16 %v1392_v22, %v1389_v18 }
 0x65a   :  { %v1419_v25 = vmul.bf16 %v2798_v34, %v1411_v37  ;;  %v2219_v34 = vld [vmem:[%s2992_s3 + $0x8] sm:$0xff]  }
 0x65b   :  { %2101 = vmatpush3.bf16.msra.mxu0 %v1415_v44  ;;  %v1418_v63 = vmul.bf16 %v2795_v33, %v1410_v45  ;;  %v2218_v33 = vld [vmem:[%s2992_s3] sm:$0xff]   ;;  %s2366_s3 = scalar_lea.vmem %s1674_s27, 256 }
 0x65c   :  { %2102 = vmatprep.subr.bf16.mxu0 %v2411_v1  ;;  %p2367_p6 = scmp.ne.s32.totalorder %s1674_s27, %s2366_s3  ;;  %p2372_p8 = scmp.lt.s32.totalorder %s2366_s3, %s2366_s3 }
 0x65e   :  { %p2373_p9 = por %p2372_p8, %p2371_p7 }
 0x65f   :  { %2103 = vmatpush3.bf16.msra.mxu0 %v1416_v2 }
 0x660   :  { %2104 = vmatprep.subr.bf16.mxu0 %v2411_v1  ;;  %p2374_p10 = pnand %p2373_p9, %p2367_p6 }
 0x663   :  { %2105 = vmatpush3.bf16.msra.mxu0 %v1417_v32 }
 0x664   :  { %2106 = vmatprep.subr.bf16.mxu0 %v2411_v1 }
 0x667   :  { %2107 = vmatpush3.bf16.msra.mxu0 %v1418_v63 }
 0x668   :  { %2108 = vmatprep.subr.bf16.mxu0 %v2411_v1 }
 0x66b   :  { %2109 = vmatpush3.bf16.msra.mxu0 %v1419_v25 }
 0x6e2   :  { %v1461_v26 = vpop.xlane.xlu1 %1460 }
 0x6e3   :  { %v1462_v39 = vsub.f32 %v1455_v15, %v1461_v26 }
 0x6e5   :  { %v1463_v40 = vmul.f32 1.442695, %v1462_v39 }
 0x6e7   :  { %2230 = vpow2.f32 %v1463_v40 }
 0x6f1   :  { %v2231_v6 = vpop.eup %2230 }
 0x6f2   :  { %v1465_v27 = vpack.c.bf16 %v2231_v6, %v2231_v6 }
 0x6f4   :  { %2091 = vmatmul.mubr.bf16.vlgmr.msra.gmra.mrb[44].mxu1 %v1465_v27 }
 0x6f5   :  { %2130 = vmatprep.mubr.msk.bf16.mxu1 %vm2412_vm0, %v2411_v1  ;;  %2115 = vmatpush3.bf16.msra.mxu1 %v2218_v33 }
 0x6f6   :  { %2116 = vmatprep.subr.bf16.mxu1 %v2411_v1 }
 0x6f9   :  { %2117 = vmatpush3.bf16.msra.mxu1 %v2219_v34 }
 0x6fa   :  { %2118 = vmatprep.subr.bf16.mxu1 %v2411_v1 }
 0x6fd   :  { %2119 = vmatpush3.bf16.msra.mxu1 %v2220_v47 }
 0x6fe   :  { %2120 = vmatprep.subr.bf16.mxu1 %v2411_v1 }
 0x701   :  { %2121 = vmatpush3.bf16.msra.mxu1 %v2221_v46 }
 0x702   :  { %2122 = vmatprep.subr.bf16.mxu1 %v2411_v1 }
 0x705   :  { %2123 = vmatpush3.bf16.msra.mxu1 %v2222_v48 }
 0x706   :  { %2124 = vmatprep.subr.bf16.mxu1 %v2411_v1 }
 0x709   :  { %2125 = vmatpush3.bf16.msra.mxu1 %v2223_v50 }
 0x70a   :  { %2126 = vmatprep.subr.bf16.mxu1 %v2411_v1 }
 0x70d   :  { %2127 = vmatpush3.bf16.msra.mxu1 %v2224_v12 }
 0x70e   :  { %2128 = vmatprep.subr.bf16.mxu1 %v2411_v1 }
 0x711   :  { %2129 = vmatpush3.bf16.msra.mxu1 %v2225_v54 }
 0x7c7   :  { %v1500_v16 = vpop.f32.mrb[44].mxu1 }
 0x7c8   :  { %v1506_v52 = vmax.f32 %v1500_v16, 1e-20  ;;  %v2092_v53 = vpop.f32.mrb[45].mxu1 }
 0x7c9   :  { %v1503_v41 = vpop.f32.mrb[46].mxu1 }
 0x7ca   :  { %2232 = vrcp.f32 %v1506_v52  ;;  %v2093_v0 = vpop.f32.mrb[47].mxu1 }
 0x7d4   :  { %v2233_v4 = vpop.eup %2232 }
 0x7d5   :  { %v1508_v23 = vmul.f32 %v2233_v4, %v2231_v6 }
 0x7d7   :  { %v1509_v42 = vpack.c.bf16 %v1508_v23, %v1508_v23 }
 0x7d9   :  { %2111 = vmatmul.mubr.bf16.vlgmr.msra.gmra.mrb[48].mxu0 %v1509_v42 }
 0x8ac   :  { %v1544_v55 = vpop.f32.mrb[48].mxu0 }
 0x8ad   :  { %v1553_v56 = vpack.c.bf16 %v1544_v55, %v2919_v35  ;;  %v2112_v57 = vpop.f32.mrb[49].mxu0 }
 0x8ae   :  { %v1547_v1 = vpop.f32.mrb[50].mxu0 }
 0x8af   :  { %v2113_v3 = vpop.f32.mrb[51].mxu0  ;;  %2131 = vmatmul.mubr.bf16.vlgmr.msra.gmra.mrb[48].mxu1 %v1553_v56 }
 0x982   :  { %v1659_v15 = vpop.f32.mrb[48].mxu1 }
 0x983   :  { %v1660_v58 = vadd.f32 %v1777_v10, %v1659_v15  ;;  %v2132_v43 = vpop.f32.mrb[49].mxu1 }
 0x984   :  { %v1662_v49 = vpop.f32.mrb[50].mxu1 }
 0x985   :  { %1666 = vst [vmem:[#allocation14] sm:$0xff] %v1660_v58  ;;  %v1663_v51 = vadd.f32 %v1777_v10, %v1662_v49  ;;  %v2133_v59 = vpop.f32.mrb[51].mxu1 }
 0x987   :  { %1667 = vst [vmem:[#allocation14 + $0x8] sm:$0xff] %v1663_v51 }
 0x988   :  { %2377 = shalt.err (!%p2374_p10)
}
 0x989   :  { %s2378_s29 = scalar_lea.hbm %s3000_s11, 256 }
 0x98a   :  { %p2379_p11 = scmp.ne.s32.totalorder %s3000_s11, %s2378_s29  ;;  %p2382_p12 = scmp.lt.u32.totalorder %s2378_s29, %s3000_s11 }
 0x98c   :  { %p2384_p13 = pnand %p2382_p12, %p2379_p11 }
 0x98e   :  { %2387 = shalt.err (!%p2384_p13)
}
 0x98f   :  { %1679 = dma.vmem_to_hbm [thread:$0]  %s1674_s27, 256, %s3000_s11, [#allocation5], %s2405_s8, %s2405_s8, %s2406_s13  }
 0x990   :  { %2396 = dma.done.wait [#allocation5], 256  }
 0x991   :  { %2397 = vsyncadd [#allocation5], 4294967040 }
 0x992   :  { %1683 = vsyncpa [#allocation4], 1 }
 0x993   :  { %1684 = vsyncpa [#allocation7], 1 }
 0x994   :  { %1685 = vsyncpa [#allocation10], 1 }
 0x995   :  { %1686 = vsyncpa [#allocation13], 1 }
 0x996   :  { %1687 = vsyncpa [#allocation5], 1 }

</bundles_post_ra>
